<compile_context>
chip_gen: v6e
topology: v6e:2x2x1
jax: 0.10.0
libtpu: 0.0.40
codegen_flags: <defaults>
</compile_context>

<pallas_src>
import functools

import jax
import jax.numpy as jnp
from jax.experimental import pallas as pl
from jax.experimental.pallas import tpu as pltpu


def _round_up(v, m):
    return ((v + m - 1) // m) * m


# ---------------------------------------------------------------------------
# Hot path 1: pairwise sum of 1 / (1 + ||x_a - x_b||^2)
# ---------------------------------------------------------------------------
def _pairwise_sum_kernel(a_ref, an_ref, bt_ref, bn_ref, o_ref, acc_ref):
    i = pl.program_id(0)
    j = pl.program_id(1)

    @pl.when(j == 0)
    def _zero():
        acc_ref[...] = jnp.zeros_like(acc_ref)

    # Symmetry: S[a, b] == S[b, a]; compute only the upper block triangle and
    # count off-diagonal blocks twice.
    @pl.when(j >= i)
    def _accumulate():
        # dist = |a|^2 + |b|^2 - 2 a.b  (cross term on the MXU)
        cross = jnp.dot(a_ref[...], bt_ref[...],
                        preferred_element_type=jnp.float32)        # (TA, TB)
        dist = an_ref[...] + bn_ref[...] - 2.0 * cross
        s = pl.reciprocal(1.0 + dist, approx=False)  # EUP; approx=True is a knob
        w = jnp.where(j == i, jnp.float32(1.0), jnp.float32(2.0))
        acc_ref[...] += w * s

    # Epilogue: one lane-reduce per row block -> per-row partial sums.
    @pl.when(j == pl.num_programs(1) - 1)
    def _finalize():
        o_ref[...] = jnp.sum(acc_ref[...], axis=1, keepdims=True)  # (TA, 1)


def _pairwise_inv_dist_sum(x_pad, n2_col, xt_pad, n2_row, ta, tb):
    n_pad, d_pad = x_pad.shape
    gi = n_pad // ta
    gj = n_pad // tb

    cost = pl.CostEstimate(
        flops=int((2 * d_pad + 8) * n_pad * n_pad),
        transcendentals=int(n_pad * n_pad),
        bytes_accessed=int(4 * ((gi + 1) * n_pad * (d_pad + 1) + n_pad)),
    )

    partials = pl.pallas_call(
        _pairwise_sum_kernel,
        out_shape=jax.ShapeDtypeStruct((n_pad, 1), jnp.float32),
        grid_spec=pltpu.PrefetchScalarGridSpec(
            num_scalar_prefetch=0,
            grid=(gi, gj),
            in_specs=[
                pl.BlockSpec((ta, d_pad), lambda i, j: (i, 0)),   # x rows  (a side)
                pl.BlockSpec((ta, 1), lambda i, j: (i, 0)),       # |a|^2
                pl.BlockSpec((d_pad, tb), lambda i, j: (0, j)),   # x^T cols (b side)
                pl.BlockSpec((1, tb), lambda i, j: (0, j)),       # |b|^2
            ],
            out_specs=pl.BlockSpec((ta, 1), lambda i, j: (i, 0)),
            scratch_shapes=[pltpu.VMEM((ta, tb), jnp.float32)],
        ),
        compiler_params=pltpu.CompilerParams(
            dimension_semantics=("parallel", "arbitrary")),
        cost_estimate=cost,
    )(x_pad, n2_col, xt_pad, n2_row)
    return jnp.sum(partials)


# ---------------------------------------------------------------------------
# Hot path 2: num, qij and the KL reduction (lane-dense over the batch).
# ---------------------------------------------------------------------------
def _loss_kernel(denom_ref, at_ref, bt_ref, pij_ref, o_ref, *, n_valid):
    diff = at_ref[...] - bt_ref[...]                       # (d_pad, B) lane-dense
    sq = jnp.sum(diff * diff, axis=0, keepdims=True)       # (1, B)
    num = pl.reciprocal(1.0 + sq, approx=False)            # (1, B)
    qij = num / denom_ref[0, 0]                            # scalar from SMEM
    pij = pij_ref[...]                                     # (1, B)
    terms = pij * (jnp.log(pij) - jnp.log(qij))
    lane = jax.lax.broadcasted_iota(jnp.int32, terms.shape, 1)
    terms = jnp.where(lane < n_valid, terms, jnp.float32(0.0))
    o_ref[...] = jnp.full((1, 1), jnp.sum(terms), jnp.float32)


# ---------------------------------------------------------------------------
# Forward wrapper: equivalent of TSNE.forward(pij, i, j) with logits.weight == x
# ---------------------------------------------------------------------------
def tsne_forward(x, pij, i, j):
    n, d = x.shape
    bsz = int(pij.shape[0])
    x = x.astype(jnp.float32)

    # ---- tiling / padding ---------------------------------------------------
    d_pad = _round_up(d, 8)
    if n >= 256:
        n_pad = _round_up(n, 256)
        ta = tb = 256
    else:
        n_pad = _round_up(n, 8)
        ta = tb = n_pad

    x_pad = jnp.zeros((n_pad, d_pad), jnp.float32).at[:n, :d].set(x)
    n2 = jnp.sum(x_pad * x_pad, axis=1, keepdims=True)               # (n_pad, 1)
    valid_row = (jnp.arange(n_pad) < n)[:, None]
    # Padding rows get a huge norm -> their 1/(1+dist) terms vanish (~1e-30).
    n2 = jnp.where(valid_row, n2, jnp.float32(1e30))
    xt_pad = x_pad.T                                                 # (d_pad, n_pad)
    n2_row = n2.reshape(1, n_pad)

    # ---- hot path 1: O(n^2) pairwise denominator -----------------------------
    psum = _pairwise_inv_dist_sum(x_pad, n2, xt_pad, n2_row, ta, tb)
    # Torch reference subtracts pij.shape[0]; fold it in here (host/JAX side).
    denom = (psum - jnp.float32(bsz)).reshape(1, 1)

    # ---- glue: embedding-row gather (plain JAX) ------------------------------
    b_pad = _round_up(bsz, 128)
    a_rows = x_pad[i.astype(jnp.int32)]                              # (bsz, d_pad)
    b_rows = x_pad[j.astype(jnp.int32)]
    at = jnp.zeros((d_pad, b_pad), jnp.float32).at[:, :bsz].set(a_rows.T)
    bt = jnp.zeros((d_pad, b_pad), jnp.float32).at[:, :bsz].set(b_rows.T)
    # Pad pij with 1.0 (log(1)=0, no NaNs); padded lanes masked in-kernel.
    pij_row = jnp.ones((1, b_pad), jnp.float32).at[0, :bsz].set(
        pij.astype(jnp.float32))

    # ---- hot path 2: num, qij, KL reduction ----------------------------------
    loss = pl.pallas_call(
        functools.partial(_loss_kernel, n_valid=bsz),
        out_shape=jax.ShapeDtypeStruct((1, 1), jnp.float32),
        in_specs=[
            pl.BlockSpec(memory_space=pltpu.MemorySpace.SMEM),   # denom scalar
            pl.BlockSpec(memory_space=pltpu.MemorySpace.VMEM),   # A^T
            pl.BlockSpec(memory_space=pltpu.MemorySpace.VMEM),   # B^T
            pl.BlockSpec(memory_space=pltpu.MemorySpace.VMEM),   # pij row
        ],
        out_specs=pl.BlockSpec(memory_space=pltpu.MemorySpace.VMEM),
    )(denom, at, bt, pij_row)

    return loss[0, 0]


# ---------------------------------------------------------------------------
# Pure-JAX reference (for a sanity check only).
# ---------------------------------------------------------------------------
def _tsne_reference(x, pij, i, j):
    x = x.astype(jnp.float32)
    sq = jnp.sum(x * x, axis=1)
    d2 = sq[:, None] + sq[None, :] - 2.0 * (x @ x.T)
    denom = jnp.sum(1.0 / (1.0 + d2)) - pij.shape[0]
    diff = x[i] - x[j]
    num = 1.0 / (1.0 + jnp.sum(diff * diff, axis=1))
    qij = num / denom
    return jnp.sum(pij * (jnp.log(pij) - jnp.log(qij)))


if __name__ == "__main__":
    # Small but non-trivial shapes: exercises row padding (300 -> 512),
    # embedding-dim padding (3 -> 8), the 2x2 triangular block grid and the
    # batch lane padding (100 -> 128).
    n_points, n_dim, batch = 300, 3, 100

    key = jax.random.PRNGKey(0)
    k1, k2, k3, k4 = jax.random.split(key, 4)

    # nn.Embedding(n_points, n_dim).weight ~ N(0, 1) -> deterministic init here.
    x = jax.random.normal(k1, (n_points, n_dim), dtype=jnp.float32)

    pij = jax.random.uniform(k2, (batch,), jnp.float32, 1e-3, 1.0)
    pij = pij / jnp.sum(pij)                       # positive probabilities
    ii = jax.random.randint(k3, (batch,), 0, n_points, jnp.int32)
    jj = jax.random.randint(k4, (batch,), 0, n_points, jnp.int32)

    loss = jax.jit(tsne_forward)(x, pij, ii, jj)
    jax.block_until_ready(loss)

    ref = _tsne_reference(x, pij, ii, jj)
    assert bool(jnp.allclose(loss, ref, rtol=2e-3, atol=1e-4)), (loss, ref)

    print("KERNEL_OK")
</pallas_src>

<mosaic_0001>
module attributes {stable_mosaic.version = 11 : i64} {
  func.func @_pairwise_sum_kernel(%arg0: i32, %arg1: i32, %arg2: memref<256x8xf32, #tpu.memory_space<vmem>>, %arg3: memref<256x1xf32, #tpu.memory_space<vmem>>, %arg4: memref<8x256xf32, #tpu.memory_space<vmem>>, %arg5: memref<1x256xf32, #tpu.memory_space<vmem>>, %arg6: memref<256x1xf32, #tpu.memory_space<vmem>>, %arg7: memref<256x256xf32, #tpu.memory_space<vmem>>) attributes {dimension_semantics = [#tpu.dimension_semantics<parallel>, #tpu.dimension_semantics<arbitrary>], iteration_bounds = array<i64: 2, 2>, scalar_prefetch = 0 : i64, scratch_operands = 1 : i64, tpu.core_type = #tpu.core_type<tc>, window_params = [{transform_indices = @transform_0, window_bounds = array<i64: 256, 8>}, {transform_indices = @transform_1, window_bounds = array<i64: 256, 1>}, {transform_indices = @transform_2, window_bounds = array<i64: 8, 256>}, {transform_indices = @transform_3, window_bounds = array<i64: 1, 256>}, {transform_indices = @transform_4, window_bounds = array<i64: 256, 1>}]} {
    %c0_i32 = arith.constant 0 : i32
    %0 = arith.cmpi eq, %arg1, %c0_i32 : i32
    %1 = arith.extui %0 : i1 to i32
    %c0_i32_0 = arith.constant 0 : i32
    %2 = arith.cmpi ne, %1, %c0_i32_0 : i32
    scf.if %2 {
      %cst = arith.constant 0.000000e+00 : f32
      %9 = vector.broadcast %cst : f32 to vector<256x256xf32>
      %c0 = arith.constant 0 : index
      %c0_3 = arith.constant 0 : index
      %10 = vector.load %arg7[%c0, %c0_3] : memref<256x256xf32, #tpu.memory_space<vmem>>, vector<256x256xf32>
      tpu.vector_store %arg7[%c0, %c0_3], %9 {strides = array<i32>} : memref<256x256xf32, #tpu.memory_space<vmem>>, vector<256x256xf32>,
    } else {
    }
    %3 = arith.cmpi sge, %arg1, %arg0 : i32
    %4 = arith.extui %3 : i1 to i32
    %c0_i32_1 = arith.constant 0 : i32
    %5 = arith.cmpi ne, %4, %c0_i32_1 : i32
    scf.if %5 {
      %c0 = arith.constant 0 : index
      %c0_3 = arith.constant 0 : index
      %9 = vector.load %arg2[%c0, %c0_3] : memref<256x8xf32, #tpu.memory_space<vmem>>, vector<256x8xf32>
      %c0_4 = arith.constant 0 : index
      %c0_5 = arith.constant 0 : index
      %10 = vector.load %arg4[%c0_4, %c0_5] : memref<8x256xf32, #tpu.memory_space<vmem>>, vector<8x256xf32>
      %cst = arith.constant dense<0.000000e+00> : vector<256x256xf32>
      %11 = tpu.matmul %9, %10, %cst {dimension_numbers = #tpu.dot_dimension_numbers<[1], [0], [0], [1], [0, 0, 1, 1], [], []>} : vector<256x8xf32>, vector<8x256xf32>, vector<256x256xf32> -> vector<256x256xf32>
      %c0_6 = arith.constant 0 : index
      %c0_7 = arith.constant 0 : index
      %12 = vector.load %arg3[%c0_6, %c0_7] : memref<256x1xf32, #tpu.memory_space<vmem>>, vector<256x1xf32>
      %c0_8 = arith.constant 0 : index
      %c0_9 = arith.constant 0 : index
      %13 = vector.load %arg5[%c0_8, %c0_9] : memref<1x256xf32, #tpu.memory_space<vmem>>, vector<1x256xf32>
      %14 = vector.broadcast %12 : vector<256x1xf32> to vector<256x256xf32>
      %15 = vector.broadcast %13 : vector<1x256xf32> to vector<256x256xf32>
      %16 = arith.addf %14, %15 : vector<256x256xf32>
      %cst_10 = arith.constant 2.000000e+00 : f32
      %17 = vector.broadcast %cst_10 : f32 to vector<256x256xf32>
      %18 = arith.mulf %17, %11 : vector<256x256xf32>
      %19 = arith.subf %16, %18 : vector<256x256xf32>
      %cst_11 = arith.constant 1.000000e+00 : f32
      %20 = vector.broadcast %cst_11 : f32 to vector<256x256xf32>
      %21 = arith.addf %20, %19 : vector<256x256xf32>
      %22 = tpu.reciprocal %21 : vector<256x256xf32> -> vector<256x256xf32>
      %23 = arith.cmpi eq, %arg1, %arg0 : i32
      %cst_12 = arith.constant 1.000000e+00 : f32
      %cst_13 = arith.constant 2.000000e+00 : f32
      %24 = arith.select %23, %cst_12, %cst_13 : f32
      %c0_14 = arith.constant 0 : index
      %c0_15 = arith.constant 0 : index
      %25 = vector.load %arg7[%c0_14, %c0_15] : memref<256x256xf32, #tpu.memory_space<vmem>>, vector<256x256xf32>
      %26 = vector.broadcast %24 : f32 to vector<256x256xf32>
      %27 = arith.mulf %26, %22 : vector<256x256xf32>
      %28 = arith.addf %25, %27 : vector<256x256xf32>
      %c0_16 = arith.constant 0 : index
      %c0_17 = arith.constant 0 : index
      %29 = vector.load %arg7[%c0_16, %c0_17] : memref<256x256xf32, #tpu.memory_space<vmem>>, vector<256x256xf32>
      tpu.vector_store %arg7[%c0_16, %c0_17], %28 {strides = array<i32>} : memref<256x256xf32, #tpu.memory_space<vmem>>, vector<256x256xf32>,
    } else {
    }
    %c1_i32 = arith.constant 1 : i32
    %6 = arith.cmpi eq, %arg1, %c1_i32 : i32
    %7 = arith.extui %6 : i1 to i32
    %c0_i32_2 = arith.constant 0 : i32
    %8 = arith.cmpi ne, %7, %c0_i32_2 : i32
    scf.if %8 {
      %c0 = arith.constant 0 : index
      %c0_3 = arith.constant 0 : index
      %9 = vector.load %arg7[%c0, %c0_3] : memref<256x256xf32, #tpu.memory_space<vmem>>, vector<256x256xf32>
      %cst = arith.constant dense<0.000000e+00> : vector<256xf32>
      %10 = vector.multi_reduction <add>, %9, %cst [1] : vector<256x256xf32> to vector<256xf32>
      %11 = vector.shape_cast %10 : vector<256xf32> to vector<256x1xf32>
      %c0_4 = arith.constant 0 : index
      %c0_5 = arith.constant 0 : index
      %12 = vector.load %arg6[%c0_4, %c0_5] : memref<256x1xf32, #tpu.memory_space<vmem>>, vector<256x1xf32>
      tpu.vector_store %arg6[%c0_4, %c0_5], %11 {strides = array<i32>} : memref<256x1xf32, #tpu.memory_space<vmem>>, vector<256x1xf32>,
    } else {
    }
    return
  }
  func.func @transform_0(%arg0: i32, %arg1: i32) -> (i32, i32) {
    %c0_i32 = arith.constant 0 : i32
    %c0_i32_0 = arith.constant 0 : i32
    return %arg0, %c0_i32 : i32, i32
  }
  func.func @transform_1(%arg0: i32, %arg1: i32) -> (i32, i32) {
    %c0_i32 = arith.constant 0 : i32
    %c0_i32_0 = arith.constant 0 : i32
    return %arg0, %c0_i32 : i32, i32
  }
  func.func @transform_2(%arg0: i32, %arg1: i32) -> (i32, i32) {
    %c0_i32 = arith.constant 0 : i32
    %c0_i32_0 = arith.constant 0 : i32
    return %c0_i32, %arg1 : i32, i32
  }
  func.func @transform_3(%arg0: i32, %arg1: i32) -> (i32, i32) {
    %c0_i32 = arith.constant 0 : i32
    %c0_i32_0 = arith.constant 0 : i32
    return %c0_i32, %arg1 : i32, i32
  }
  func.func @transform_4(%arg0: i32, %arg1: i32) -> (i32, i32) {
    %c0_i32 = arith.constant 0 : i32
    %c0_i32_0 = arith.constant 0 : i32
    return %arg0, %c0_i32 : i32, i32
  }
}

module attributes {stable_mosaic.version = 11 : i64} {
  func.func @_loss_kernel(%arg0: memref<1x1xf32, #tpu.memory_space<smem>>, %arg1: memref<8x128xf32, #tpu.memory_space<vmem>>, %arg2: memref<8x128xf32, #tpu.memory_space<vmem>>, %arg3: memref<1x128xf32, #tpu.memory_space<vmem>>, %arg4: memref<1x1xf32, #tpu.memory_space<vmem>>) attributes {dimension_semantics = [], scalar_prefetch = 0 : i64, scratch_operands = 0 : i64, tpu.core_type = #tpu.core_type<tc>} {
    %c0 = arith.constant 0 : index
    %c0_0 = arith.constant 0 : index
    %0 = vector.load %arg1[%c0, %c0_0] : memref<8x128xf32, #tpu.memory_space<vmem>>, vector<8x128xf32>
    %c0_1 = arith.constant 0 : index
    %c0_2 = arith.constant 0 : index
    %1 = vector.load %arg2[%c0_1, %c0_2] : memref<8x128xf32, #tpu.memory_space<vmem>>, vector<8x128xf32>
    %2 = arith.subf %0, %1 : vector<8x128xf32>
    %3 = arith.mulf %2, %2 : vector<8x128xf32>
    %cst = arith.constant dense<0.000000e+00> : vector<128xf32>
    %4 = vector.multi_reduction <add>, %3, %cst [0] : vector<8x128xf32> to vector<128xf32>
    %5 = vector.shape_cast %4 : vector<128xf32> to vector<1x128xf32>
    %cst_3 = arith.constant 1.000000e+00 : f32
    %6 = vector.broadcast %cst_3 : f32 to vector<1x128xf32>
    %7 = arith.addf %6, %5 : vector<1x128xf32>
    %8 = tpu.reciprocal %7 : vector<1x128xf32> -> vector<1x128xf32>
    %c0_4 = arith.constant 0 : index
    %c0_5 = arith.constant 0 : index
    %9 = memref.load %arg0[%c0_4, %c0_5] : memref<1x1xf32, #tpu.memory_space<smem>>
    %10 = vector.broadcast %9 : f32 to vector<1x128xf32>
    %11 = arith.divf %8, %10 : vector<1x128xf32>
    %c0_6 = arith.constant 0 : index
    %c0_7 = arith.constant 0 : index
    %12 = vector.load %arg3[%c0_6, %c0_7] : memref<1x128xf32, #tpu.memory_space<vmem>>, vector<1x128xf32>
    %13 = math.log %12 : vector<1x128xf32>
    %14 = math.log %11 : vector<1x128xf32>
    %15 = arith.subf %13, %14 : vector<1x128xf32>
    %16 = arith.mulf %12, %15 : vector<1x128xf32>
    %17 = tpu.iota {dimensions = array<i32: 1>} : vector<1x128xi32>
    %c100_i32 = arith.constant 100 : i32
    %18 = vector.broadcast %c100_i32 : i32 to vector<1x128xi32>
    %19 = arith.cmpi slt, %17, %18 : vector<1x128xi32>
    %cst_8 = arith.constant 0.000000e+00 : f32
    %20 = vector.broadcast %cst_8 : f32 to vector<1x128xf32>
    %21 = arith.select %19, %16, %20 : vector<1x128xi1>, vector<1x128xf32>
    %22 = vector.shape_cast %21 : vector<1x128xf32> to vector<1x1x128xf32>
    %cst_9 = arith.constant dense<0.000000e+00> : vector<1xf32>
    %23 = vector.multi_reduction <add>, %22, %cst_9 [1, 2] : vector<1x1x128xf32> to vector<1xf32>
    %24 = vector.shape_cast %23 : vector<1xf32> to vector<1x1x1xf32>
    %25 = vector.extract %24[0, 0, 0] : f32 from vector<1x1x1xf32>
    %26 = vector.broadcast %25 : f32 to vector<1x1xf32>
    %c0_10 = arith.constant 0 : index
    %c0_11 = arith.constant 0 : index
    %27 = vector.load %arg4[%c0_10, %c0_11] : memref<1x1xf32, #tpu.memory_space<vmem>>, vector<1x1xf32>
    tpu.vector_store %arg4[%c0_10, %c0_11], %26 {strides = array<i32>} : memref<1x1xf32, #tpu.memory_space<vmem>>, vector<1x1xf32>,
    return
  }
}

</mosaic_0001>

<bundles_post_ra>
// kernel: tsne_forward.3
= control target key start
LH: loop header
LB: loop body
LE: loop exit
PB: predicated region body
PF: predicated region fallthrough
CT: control target
= control target key end

     0   :  { %s148_s0 = inlined_call_operand.<no memory space> [shape: f32[1,1], index: 0, kind: input, shape index: {}]   ;;  %s149_s1 = inlined_call_operand.vmem [shape: f32[8,128], index: 1, kind: input, shape index: {}]   ;;  %s150_s2 = inlined_call_operand.vmem [shape: f32[8,128], index: 2, kind: input, shape index: {}]   ;;  %s151_s3 = inlined_call_operand.vmem [shape: f32[1,128], index: 3, kind: input, shape index: {}]   ;;  %s152_s4 = inlined_call_operand.hbm [shape: f32[1,1], index: 4, kind: output, shape index: {}]  }
   0x1   :  { %v19_v0 = vld [vmem:[%s149_s1] sm:$0xff] }
   0x2   :  { %v20_v1 = vld [vmem:[%s150_s2] sm:$0xff] }
   0x3   :  { %v21_v2 = vsub.f32 %v19_v0, %v20_v1 }
   0x4   :  { %10 = vsyncpa [#allocation4], 0  ;;  %v32_v9 = vstv %s148_s0  ;;  %v35_v12 = vld [vmem:[%s151_s3] sm:$0x1]  ;;  %v42_v17 = vlaneseq  ;;  %vm46_vm1 = vcmask 1040384   ;;  %s107_s0 = smov [#allocation3]  }
   0x5   :  { %v22_v3 = vmul.f32 %v21_v2, %v21_v2  ;;  %77 = vrcp.f32 %v32_v9  ;;  %s66_s2 = sshll.u32 %s107_s0, 4  ;;  %vm58_vm2 = vcmask 0   ;;  %s67_s2 = int_to_ptr.vmem [resolvable:$true] %s66_s2 }
   0x6   :  { %v43_v20 = vand.u32 127, %v42_v17  ;;  %s85_s22 = scalar_lea.vmem %s67_s2, 16  ;;  %s89_s23 = scalar_lea.vmem %s67_s2, 32 }
   0x7   :  { %v23_v4 = vrot.slane %v22_v3, 4  ;;  %p86_p0 = scmp.ne.s32.totalorder %s67_s2, %s85_s22  ;;  %p90_p1 = scmp.lt.s32.totalorder %s67_s2, %s67_s2 }
   0x8   :  { %vm44_vm0 = vcmp.lt.s32.totalorder %v43_v20, 100  ;;  %p91_p2 = scmp.lt.s32.totalorder %s89_s23, %s85_s22 }
   0x9   :  { %v24_v5 = vadd.f32 %v23_v4, %v22_v3 }
   0xa   :  { %p92_p3 = por %p91_p2, %p90_p1 }
   0xb   :  { %v25_v6 = vrot.slane %v24_v5, 2 }
   0xc   :  { %p93_p4 = pnand %p92_p3, %p86_p0 }
   0xd   :  { %v26_v7 = vadd.f32 %v25_v6, %v24_v5 }
   0xf   :  { %v27_v8 = vrot.slane %v26_v7, 1 }
  0x11   :  { %v28_v10 = vadd.f32 %v27_v8, %v26_v7 }
  0x12   :  { %v78_v13 = vpop.eup %77 }
  0x13   :  { %v29_v11 = vadd.f32 1.0, %v28_v10 }
  0x15   :  { %79 = vrcp.f32 %v29_v11 }
  0x16   :  { %81 = vlog2.f32 %v35_v12 }
  0x22   :  { %v80_v14 = vpop.eup %79 }
  0x23   :  { %v34_v15 = vmul.f32 %v80_v14, %v78_v13  ;;  %v82_v16 = vpop.eup %81 }
  0x24   :  { %v37_v18 = vmul.f32 0.6931472, %v82_v16 }
  0x25   :  { %83 = vlog2.f32 %v34_v15 }
  0x32   :  { %v84_v19 = vpop.eup %83 }
  0x33   :  { %v39_v21 = vmul.f32 0.6931472, %v84_v19 }
  0x35   :  { %v40_v22 = vsub.f32 %v37_v18, %v39_v21 }
  0x37   :  { %v41_v23 = vmul.f32 %v40_v22, %v35_v12 }
  0x39   :  { %v45_v24 = vsel %vm44_vm0, %v41_v23, 0.0 }
  0x3a   :  { %v47_v25 = vsel %vm46_vm1, %v45_v24, 0.0 }
  0x3b   :  { %48 = vadd.xlane.f32.xlu0 %v47_v25 }
  0xc4   :  { %v49_v26 = vpop.xlane.xlu0 %48 }
  0xc5   :  { %v50_v27 = vrot.slane %v49_v26, 4 }
  0xc7   :  { %v51_v28 = vadd.f32 %v50_v27, %v49_v26 }
  0xc9   :  { %v52_v29 = vrot.slane %v51_v28, 2 }
  0xcb   :  { %v53_v30 = vadd.f32 %v52_v29, %v51_v28 }
  0xcd   :  { %v54_v31 = vrot.slane %v53_v30, 1 }
  0xcf   :  { %v55_v32 = vadd.f32 %v54_v31, %v53_v30 }
  0xd1   :  { %74 = vpush %v55_v32 }
 0x102   :  { %s75_s3 = spop %74 }
 0x103   :  { %v57_v33 = vstv %s75_s3 }
 0x104   :  { %59 = vst.msk [vmem:[#allocation3] sm:$0x1] %vm58_vm2, %v57_v33 }
 0x105   :  { %96 = shalt.err (!%p93_p4)
}
 0x106   :  { %69 = dma.vmem_to_hbm [thread:$0]  %s67_s2, 16, %s152_s4, [#allocation4]  }
 0x107   :  { %105 = dma.done.wait [#allocation4], 16  }
 0x108   :  { %106 = vsyncadd [#allocation4], 4294967280 }
 0x109   :  { %73 = vsyncpa [#allocation4], 1 }

// kernel: tsne_forward.2
= control target key start
LH: loop header
LB: loop body
LE: loop exit
PB: predicated region body
PF: predicated region fallthrough
CT: control target
= control target key end

     0   :  { %s2111_s15 = smov 0   ;;  %s2113_s16 = smov 0   ;;  %s2854_s0 = inlined_call_operand.vmem [shape: f32[512,8], index: 0, kind: input, shape index: {}]   ;;  %s2855_s1 = inlined_call_operand.vmem [shape: f32[512,1], index: 1, kind: input, shape index: {}]   ;;  %s2856_s2 = inlined_call_operand.vmem [shape: f32[8,512], index: 2, kind: input, shape index: {}]   ;;  %s2857_s3 = inlined_call_operand.vmem [shape: f32[1,512], index: 3, kind: input, shape index: {}]   ;;  %s2858_s4 = inlined_call_operand.vmem [shape: f32[512,1], index: 4, kind: output, shape index: {}]  }
   0x1   :  { %s2115_s17 = smov 0   ;;  %s2117_s18 = smov 0  }
   0x2   :  { %s2119_s19 = smov 0  }
   0x3 LB: > { %s23_s20 = sadd.s32 1, %s2073_s17  ;;  %s26_s21 = sadd.s32 1, %s2077_s18  ;;  %s2081_s19 = sphi %s2119_s19, %s14_s19   ;;  %s2077_s18 = sphi %s2117_s18, %s2901_s18   ;;  %s2073_s17 = sphi %s2115_s17, %s2900_s17   ;;  %s2069_s16 = sphi %s2113_s16, %s2899_s16   ;;  %s2065_s15 = sphi %s2111_s15, %s2898_s15  }
   0x4   : > { %p24_p0 = scmp.ge.s32.totalorder %s23_s20, 2  ;;  %p1821_p1 = scmp.ge.s32.totalorder %s2081_s19, 1 }
   0x5   : > { %p207_p2 = scmp.lt.s32.totalorder %s2081_s19, 5 }
   0x6   : > { %s2903_s20 = smov (%p24_p0, %s23_s20), 0  ;;  %s2905_s21 = smov (!%p24_p0, %s26_s21), %s2077_s18 }
   0x7   : > { %p208_p3 = pnand %p1821_p1, %p207_p2  ;;  %p28_p4 = scmp.ge.s32.totalorder %s2905_s21, 2 }
   0x8   : > { %s1822_s22 = sshll.u32 (!%p208_p3), %s2069_s16, 5  ;;  %s1826_s23 = sshll.u32 (!%p208_p3), %s2065_s15, 1 }
   0x9   : > { %s2907_s21 = smov (%p28_p4, %s2905_s21), 0  ;;  %211 = sbr.rel (%p208_p3) target bundleno = 587 (0x24b), region = 36 }
   0xa   : > { %p248_p5 = scmp.lt.s32.totalorder (!%p208_p3), %s1822_s22, 63  ;;  %p260_p6 = scmp.lt.s32.totalorder (!%p208_p3), %s1826_s23, 3 }
   0xb   : > { %p1831_p7 = scmp.ne.s32.totalorder (!%p208_p3), %s2065_s15, 0 }
   0xe   : > { %s2909_s22 = smov (!%p248_p5, %s1822_s22), 63  ;;  %s2911_s23 = smov (!%p260_p6, %s1826_s23), 3 }
   0xf   : > { %s1823_s24 = sshll.u32 %s2909_s22, 3  ;;  %s1827_s5 = sshll.u32 %s2911_s23, 3 }
  0x10   : > { %s2152_s27 = scalar_lea.vmem %s2854_s0, %s1823_s24  ;;  %s2157_s30 = scalar_lea.vmem %s2855_s1, %s1823_s24 }
  0x11   : > { %s268_s8 = scalar_lea.vmem %s2857_s3, %s2911_s23  ;;  %s2167_s11 = scalar_lea.vmem %s2856_s2, %s1827_s5 }
  0x12   : > { %s2172_s14 = scalar_lea.vmem %s2858_s4, %s1823_s24  ;;  %279 = sbr.rel (%p1831_p7) target bundleno = 56 (0x38), region = 40 }
  0x17   : > { %v2083_v0 = vmov 0.0  }
  0x18   : > { %280 = vst [vmem:[#allocation2 + $0xb0] sm:$0xff] %v2083_v0  ;;  %281 = vst [vmem:[#allocation2 + $0x1b0] sm:$0xff] %v2083_v0 }
  0x19   : > { %282 = vst [vmem:[#allocation2 + $0xd8] sm:$0xff] %v2083_v0  ;;  %283 = vst [vmem:[#allocation2 + $0x18] sm:$0xff] %v2083_v0 }
  0x1a   : > { %284 = vst [vmem:[#allocation2 + $0x50] sm:$0xff] %v2083_v0  ;;  %285 = vst [vmem:[#allocation2 + $0x168] sm:$0xff] %v2083_v0 }
  0x1b   : > { %286 = vst [vmem:[#allocation2 + $0x130] sm:$0xff] %v2083_v0  ;;  %287 = vst [vmem:[#allocation2 + $0x48] sm:$0xff] %v2083_v0 }
  0x1c   : > { %288 = vst [vmem:[#allocation2 + $0x180] sm:$0xff] %v2083_v0  ;;  %289 = vst [vmem:[#allocation2 + $0x110] sm:$0xff] %v2083_v0 }
  0x1d   : > { %290 = vst [vmem:[#allocation2 + $0x118] sm:$0xff] %v2083_v0  ;;  %291 = vst [vmem:[#allocation2 + $0x98] sm:$0xff] %v2083_v0 }
  0x1e   : > { %292 = vst [vmem:[#allocation2 + $0x120] sm:$0xff] %v2083_v0  ;;  %293 = vst [vmem:[#allocation2 + $0x150] sm:$0xff] %v2083_v0 }
  0x1f   : > { %294 = vst [vmem:[#allocation2 + $0x108] sm:$0xff] %v2083_v0  ;;  %295 = vst [vmem:[#allocation2 + $0x60] sm:$0xff] %v2083_v0 }
  0x20   : > { %296 = vst [vmem:[#allocation2 + $0xe0] sm:$0xff] %v2083_v0  ;;  %297 = vst [vmem:[#allocation2 + $0x188] sm:$0xff] %v2083_v0 }
  0x21   : > { %298 = vst [vmem:[#allocation2 + $0x138] sm:$0xff] %v2083_v0  ;;  %299 = vst [vmem:[#allocation2 + $0x140] sm:$0xff] %v2083_v0 }
  0x22   : > { %300 = vst [vmem:[#allocation2 + $0x80] sm:$0xff] %v2083_v0  ;;  %301 = vst [vmem:[#allocation2 + $0x1a8] sm:$0xff] %v2083_v0 }
  0x23   : > { %302 = vst [vmem:[#allocation2 + $0x1b8] sm:$0xff] %v2083_v0  ;;  %303 = vst [vmem:[#allocation2 + $0x28] sm:$0xff] %v2083_v0 }
  0x24   : > { %304 = vst [vmem:[#allocation2 + $0x1e8] sm:$0xff] %v2083_v0  ;;  %305 = vst [vmem:[#allocation2 + $0xf8] sm:$0xff] %v2083_v0 }
  0x25   : > { %306 = vst [vmem:[#allocation2 + $0x160] sm:$0xff] %v2083_v0  ;;  %307 = vst [vmem:[#allocation2 + $0x30] sm:$0xff] %v2083_v0 }
  0x26   : > { %308 = vst [vmem:[#allocation2 + $0x1e0] sm:$0xff] %v2083_v0  ;;  %309 = vst [vmem:[#allocation2] sm:$0xff] %v2083_v0 }
  0x27   : > { %310 = vst [vmem:[#allocation2 + $0xf0] sm:$0xff] %v2083_v0  ;;  %311 = vst [vmem:[#allocation2 + $0x8] sm:$0xff] %v2083_v0 }
  0x28   : > { %312 = vst [vmem:[#allocation2 + $0x148] sm:$0xff] %v2083_v0  ;;  %313 = vst [vmem:[#allocation2 + $0x1d0] sm:$0xff] %v2083_v0 }
  0x29   : > { %314 = vst [vmem:[#allocation2 + $0x100] sm:$0xff] %v2083_v0  ;;  %315 = vst [vmem:[#allocation2 + $0xc8] sm:$0xff] %v2083_v0 }
  0x2a   : > { %316 = vst [vmem:[#allocation2 + $0x40] sm:$0xff] %v2083_v0  ;;  %317 = vst [vmem:[#allocation2 + $0x1f8] sm:$0xff] %v2083_v0 }
  0x2b   : > { %318 = vst [vmem:[#allocation2 + $0x20] sm:$0xff] %v2083_v0  ;;  %319 = vst [vmem:[#allocation2 + $0x128] sm:$0xff] %v2083_v0 }
  0x2c   : > { %320 = vst [vmem:[#allocation2 + $0x1a0] sm:$0xff] %v2083_v0  ;;  %321 = vst [vmem:[#allocation2 + $0x1f0] sm:$0xff] %v2083_v0 }
  0x2d   : > { %322 = vst [vmem:[#allocation2 + $0xe8] sm:$0xff] %v2083_v0  ;;  %323 = vst [vmem:[#allocation2 + $0x78] sm:$0xff] %v2083_v0 }
  0x2e   : > { %324 = vst [vmem:[#allocation2 + $0x70] sm:$0xff] %v2083_v0  ;;  %325 = vst [vmem:[#allocation2 + $0x90] sm:$0xff] %v2083_v0 }
  0x2f   : > { %326 = vst [vmem:[#allocation2 + $0x1d8] sm:$0xff] %v2083_v0  ;;  %327 = vst [vmem:[#allocation2 + $0xd0] sm:$0xff] %v2083_v0 }
  0x30   : > { %328 = vst [vmem:[#allocation2 + $0xb8] sm:$0xff] %v2083_v0  ;;  %329 = vst [vmem:[#allocation2 + $0x88] sm:$0xff] %v2083_v0 }
  0x31   : > { %330 = vst [vmem:[#allocation2 + $0xa8] sm:$0xff] %v2083_v0  ;;  %331 = vst [vmem:[#allocation2 + $0x1c8] sm:$0xff] %v2083_v0 }
  0x32   : > { %332 = vst [vmem:[#allocation2 + $0x170] sm:$0xff] %v2083_v0  ;;  %333 = vst [vmem:[#allocation2 + $0x178] sm:$0xff] %v2083_v0 }
  0x33   : > { %334 = vst [vmem:[#allocation2 + $0x68] sm:$0xff] %v2083_v0  ;;  %335 = vst [vmem:[#allocation2 + $0x190] sm:$0xff] %v2083_v0 }
  0x34   : > { %336 = vst [vmem:[#allocation2 + $0x198] sm:$0xff] %v2083_v0  ;;  %337 = vst [vmem:[#allocation2 + $0x38] sm:$0xff] %v2083_v0 }
  0x35   : > { %338 = vst [vmem:[#allocation2 + $0xc0] sm:$0xff] %v2083_v0  ;;  %339 = vst [vmem:[#allocation2 + $0x1c0] sm:$0xff] %v2083_v0 }
  0x36   : > { %340 = vst [vmem:[#allocation2 + $0x158] sm:$0xff] %v2083_v0  ;;  %341 = vst [vmem:[#allocation2 + $0x10] sm:$0xff] %v2083_v0 }
  0x37   : > { %342 = vst [vmem:[#allocation2 + $0x58] sm:$0xff] %v2083_v0  ;;  %343 = vst [vmem:[#allocation2 + $0xa0] sm:$0xff] %v2083_v0 }
  0x38 PF: > { %p1832_p8 = scmp.lt.s32.totalorder %s2065_s15, %s2069_s16 }
  0x3a   : > { %347 = sbr.rel (%p1832_p8) target bundleno = 376 (0x178), region = 44 }
  0x3f   : > { %v381_v1 = vld [vmem:[%s2167_s11 + $0x8] sm:$0xff]  ;;  %v380_v2 = vld [vmem:[%s2167_s11] sm:$0xff]  ;;  %vm382_vm0 = vcmask 64512   ;;  %v2084_v5 = vmov 0.0   ;;  %v738_v6 = vld [vmem:[%s2157_s30 + $0x10] sm:$0xff]  ;;  %v2085_v10 = vmov 0   ;;  %p1260_p9 = scmp.eq.s32.totalorder %s2065_s15, %s2069_s16 }
  0x40   : > { %509 = vmatprep.subr.mxu0 %v381_v1  ;;  %1868 = vmatprep.subr.mxu1 %v381_v1  ;;  %v348_v3 = vld [vmem:[%s2152_s27] sm:$0xff]  ;;  %v349_v8 = vld [vmem:[%s2152_s27 + $0x8] sm:$0xff]  ;;  %v739_v11 = vld [vmem:[%s2157_s30 + $0x18] sm:$0xff] }
  0x41   : > { %v364_v4 = vld [vmem:[%s2152_s27 + $0x80] sm:$0xff]  ;;  %510 = vmatpush1.msra.mxu0 %v380_v2  ;;  %1869 = vmatpush1.msra.mxu1 %v380_v2  ;;  %v365_v9 = vld [vmem:[%s2152_s27 + $0x88] sm:$0xff]  ;;  %v350_v13 = vld [vmem:[%s2152_s27 + $0x10] sm:$0xff]  ;;  %s1261_s23 = scalar_select %p1260_p9, 1.0, 2.0 }
  0x42   : > { %543 = vmatprep.mubr.f32.mxu0 %v2084_v5  ;;  %639 = vmatprep.mubr.f32.mxu1 %v2084_v5  ;;  %v736_v7 = vld [vmem:[%s2157_s30] sm:$0xff]  ;;  %v737_v12 = vld [vmem:[%s2157_s30 + $0x8] sm:$0xff]  ;;  %v366_v14 = vld [vmem:[%s2152_s27 + $0x90] sm:$0xff] }
  0x43   : > { %1833 = vmatmul.mubr.msk.f32.vlgmr.msra.gmra.mxu0 %vm382_vm0, %v348_v3  ;;  %1849 = vmatmul.mubr.msk.f32.vlgmr.msra.gmra.mxu1 %vm382_vm0, %v364_v4  ;;  %v741_v15 = vld [vmem:[%s2157_s30 + $0x28] sm:$0xff]  ;;  %v740_v16 = vld [vmem:[%s2157_s30 + $0x20] sm:$0xff]  ;;  %v351_v17 = vld [vmem:[%s2152_s27 + $0x18] sm:$0xff] }
  0x44   : > { %549 = vmatprep.mubr.f32.mxu0 %v2084_v5  ;;  %645 = vmatprep.mubr.f32.mxu1 %v2084_v5  ;;  %v367_v18 = vld [vmem:[%s2152_s27 + $0x98] sm:$0xff]  ;;  %v742_v20 = vld [vmem:[%s2157_s30 + $0x30] sm:$0xff]  ;;  %v352_v21 = vld [vmem:[%s2152_s27 + $0x20] sm:$0xff] }
  0x45   : > { %1914 = vset.pattern.permute.xlu1 %v2085_v10  ;;  %1913 = vset.pattern.permute.xlu0 %v2085_v10  ;;  %v743_v19 = vld [vmem:[%s2157_s30 + $0x38] sm:$0xff]  ;;  %v368_v22 = vld [vmem:[%s2152_s27 + $0xa0] sm:$0xff]  ;;  %v745_v23 = vld [vmem:[%s2157_s30 + $0x48] sm:$0xff] }
  0x46   : > { %781 = vperm.xlu1 %1914, %v738_v6   ;;  %771 = vperm.xlu0 %1913, %v736_v7   ;;  %v744_v24 = vld [vmem:[%s2157_s30 + $0x40] sm:$0xff]  ;;  %v353_v25 = vld [vmem:[%s2152_s27 + $0x28] sm:$0xff]  ;;  %v747_v27 = vld [vmem:[%s2157_s30 + $0x58] sm:$0xff] }
  0x47   : > { %1834 = vmatmul.mubr.msk.f32.gmra.mxu0 %vm382_vm0, %v349_v8  ;;  %1850 = vmatmul.mubr.msk.f32.gmra.mxu1 %vm382_vm0, %v365_v9  ;;  %v369_v26 = vld [vmem:[%s2152_s27 + $0xa8] sm:$0xff]  ;;  %v746_v28 = vld [vmem:[%s2157_s30 + $0x50] sm:$0xff]  ;;  %v748_v32 = vld [vmem:[%s2157_s30 + $0x60] sm:$0xff] }
  0x48   : > { %555 = vmatprep.mubr.f32.mxu0 %v2084_v5  ;;  %651 = vmatprep.mubr.f32.mxu1 %v2084_v5  ;;  %v354_v29 = vld [vmem:[%s2152_s27 + $0x30] sm:$0xff]  ;;  %v749_v31 = vld [vmem:[%s2157_s30 + $0x68] sm:$0xff]  ;;  %v355_v33 = vld [vmem:[%s2152_s27 + $0x38] sm:$0xff] }
  0x49   : > { %v370_v30 = vld [vmem:[%s2152_s27 + $0xb0] sm:$0xff]  ;;  %v371_v34 = vld [vmem:[%s2152_s27 + $0xb8] sm:$0xff]  ;;  %v356_v37 = vld [vmem:[%s2152_s27 + $0x40] sm:$0xff] }
  0x4a   : > { %786 = vperm.xlu1 %1914, %v739_v11   ;;  %776 = vperm.xlu0 %1913, %v737_v12   ;;  %v751_v35 = vld [vmem:[%s2157_s30 + $0x78] sm:$0xff]  ;;  %v750_v36 = vld [vmem:[%s2157_s30 + $0x70] sm:$0xff]  ;;  %v372_v38 = vld [vmem:[%s2152_s27 + $0xc0] sm:$0xff] }
  0x4b   : > { %1835 = vmatmul.mubr.msk.f32.gmra.mxu0 %vm382_vm0, %v350_v13  ;;  %1851 = vmatmul.mubr.msk.f32.gmra.mxu1 %vm382_vm0, %v366_v14  ;;  %v753_v39 = vld [vmem:[%s2157_s30 + $0x88] sm:$0xff]  ;;  %v752_v40 = vld [vmem:[%s2157_s30 + $0x80] sm:$0xff]  ;;  %v755_v43 = vld [vmem:[%s2157_s30 + $0x98] sm:$0xff] }
  0x4c   : > { %561 = vmatprep.mubr.f32.mxu0 %v2084_v5  ;;  %657 = vmatprep.mubr.f32.mxu1 %v2084_v5  ;;  %v357_v41 = vld [vmem:[%s2152_s27 + $0x48] sm:$0xff]  ;;  %v754_v44 = vld [vmem:[%s2157_s30 + $0x90] sm:$0xff]  ;;  %v756_v48 = vld [vmem:[%s2157_s30 + $0xa0] sm:$0xff] }
  0x4d   : > { %v373_v42 = vld [vmem:[%s2152_s27 + $0xc8] sm:$0xff]  ;;  %v358_v45 = vld [vmem:[%s2152_s27 + $0x50] sm:$0xff]  ;;  %v359_v49 = vld [vmem:[%s2152_s27 + $0x58] sm:$0xff] }
  0x4e   : > { %796 = vperm.xlu1 %1914, %v741_v15   ;;  %791 = vperm.xlu0 %1913, %v740_v16   ;;  %v374_v46 = vld [vmem:[%s2152_s27 + $0xd0] sm:$0xff]  ;;  %v757_v47 = vld [vmem:[%s2157_s30 + $0xa8] sm:$0xff]  ;;  %v375_v50 = vld [vmem:[%s2152_s27 + $0xd8] sm:$0xff] }
  0x4f   : > { %1836 = vmatmul.mubr.msk.f32.gmra.mxu0 %vm382_vm0, %v351_v17  ;;  %1852 = vmatmul.mubr.msk.f32.gmra.mxu1 %vm382_vm0, %v367_v18  ;;  %v759_v51 = vld [vmem:[%s2157_s30 + $0xb8] sm:$0xff]  ;;  %v758_v52 = vld [vmem:[%s2157_s30 + $0xb0] sm:$0xff]  ;;  %v360_v53 = vld [vmem:[%s2152_s27 + $0x60] sm:$0xff] }
  0x50   : > { %567 = vmatprep.mubr.f32.mxu0 %v2084_v5  ;;  %663 = vmatprep.mubr.f32.mxu1 %v2084_v5  ;;  %v376_v54 = vld [vmem:[%s2152_s27 + $0xe0] sm:$0xff]  ;;  %v761_v55 = vld [vmem:[%s2157_s30 + $0xc8] sm:$0xff]  ;;  %v763_v59 = vld [vmem:[%s2157_s30 + $0xd8] sm:$0xff] }
  0x51   : > { %v760_v56 = vld [vmem:[%s2157_s30 + $0xc0] sm:$0xff]  ;;  %v361_v57 = vld [vmem:[%s2152_s27 + $0x68] sm:$0xff]  ;;  %v762_v60 = vld [vmem:[%s2157_s30 + $0xd0] sm:$0xff] }
  0x52   : > { %806 = vperm.xlu1 %1914, %v743_v19   ;;  %801 = vperm.xlu0 %1913, %v742_v20   ;;  %v377_v58 = vld [vmem:[%s2152_s27 + $0xe8] sm:$0xff]  ;;  %v362_v61 = vld [vmem:[%s2152_s27 + $0x70] sm:$0xff]  ;;  %v764_v0 = vld [vmem:[%s2157_s30 + $0xe0] sm:$0xff] }
  0x53   : > { %1837 = vmatmul.mubr.msk.f32.gmra.mxu0 %vm382_vm0, %v352_v21  ;;  %1853 = vmatmul.mubr.msk.f32.gmra.mxu1 %vm382_vm0, %v368_v22  ;;  %v378_v62 = vld [vmem:[%s2152_s27 + $0xf0] sm:$0xff]  ;;  %v765_v63 = vld [vmem:[%s2157_s30 + $0xe8] sm:$0xff]  ;;  %v363_v1 = vld [vmem:[%s2152_s27 + $0x78] sm:$0xff] }
  0x54   : > { %573 = vmatprep.mubr.f32.mxu0 %v2084_v5  ;;  %669 = vmatprep.mubr.f32.mxu1 %v2084_v5  ;;  %v379_v2 = vld [vmem:[%s2152_s27 + $0xf8] sm:$0xff]  ;;  %v766_v4 = vld [vmem:[%s2157_s30 + $0xf0] sm:$0xff]  ;;  %v768_v19 = vld [vmem:[%s268_s8] sm:$0x3] }
  0x55   : > { %v767_v3 = vld [vmem:[%s2157_s30 + $0xf8] sm:$0xff] }
  0x56   : > { %816 = vperm.xlu1 %1914, %v745_v23   ;;  %811 = vperm.xlu0 %1913, %v744_v24  }
  0x57   : > { %1838 = vmatmul.mubr.msk.f32.gmra.mxu0 %vm382_vm0, %v353_v25  ;;  %1854 = vmatmul.mubr.msk.f32.gmra.mxu1 %vm382_vm0, %v369_v26 }
  0x58   : > { %579 = vmatprep.mubr.f32.mxu0 %v2084_v5  ;;  %675 = vmatprep.mubr.f32.mxu1 %v2084_v5 }
  0x5a   : > { %826 = vperm.xlu1 %1914, %v747_v27   ;;  %821 = vperm.xlu0 %1913, %v746_v28  }
  0x5b   : > { %1839 = vmatmul.mubr.msk.f32.gmra.mxu0 %vm382_vm0, %v354_v29  ;;  %1855 = vmatmul.mubr.msk.f32.gmra.mxu1 %vm382_vm0, %v370_v30 }
  0x5c   : > { %585 = vmatprep.mubr.f32.mxu0 %v2084_v5  ;;  %681 = vmatprep.mubr.f32.mxu1 %v2084_v5 }
  0x5e   : > { %836 = vperm.xlu1 %1914, %v749_v31   ;;  %831 = vperm.xlu0 %1913, %v748_v32  }
  0x5f   : > { %1840 = vmatmul.mubr.msk.f32.gmra.mxu0 %vm382_vm0, %v355_v33  ;;  %1856 = vmatmul.mubr.msk.f32.gmra.mxu1 %vm382_vm0, %v371_v34 }
  0x60   : > { %591 = vmatprep.mubr.f32.mxu0 %v2084_v5  ;;  %687 = vmatprep.mubr.f32.mxu1 %v2084_v5 }
  0x62   : > { %846 = vperm.xlu1 %1914, %v751_v35   ;;  %841 = vperm.xlu0 %1913, %v750_v36  }
  0x63   : > { %1841 = vmatmul.mubr.msk.f32.gmra.mxu0 %vm382_vm0, %v356_v37  ;;  %1857 = vmatmul.mubr.msk.f32.gmra.mxu1 %vm382_vm0, %v372_v38 }
  0x64   : > { %597 = vmatprep.mubr.f32.mxu0 %v2084_v5  ;;  %693 = vmatprep.mubr.f32.mxu1 %v2084_v5 }
  0x66   : > { %856 = vperm.xlu1 %1914, %v753_v39   ;;  %851 = vperm.xlu0 %1913, %v752_v40  }
  0x67   : > { %1842 = vmatmul.mubr.msk.f32.gmra.mxu0 %vm382_vm0, %v357_v41  ;;  %1858 = vmatmul.mubr.msk.f32.gmra.mxu1 %vm382_vm0, %v373_v42 }
  0x68   : > { %603 = vmatprep.mubr.f32.mxu0 %v2084_v5  ;;  %699 = vmatprep.mubr.f32.mxu1 %v2084_v5 }
  0x6a   : > { %866 = vperm.xlu1 %1914, %v755_v43   ;;  %861 = vperm.xlu0 %1913, %v754_v44  }
  0x6b   : > { %1843 = vmatmul.mubr.msk.f32.gmra.mxu0 %vm382_vm0, %v358_v45  ;;  %1859 = vmatmul.mubr.msk.f32.gmra.mxu1 %vm382_vm0, %v374_v46 }
  0x6c   : > { %609 = vmatprep.mubr.f32.mxu0 %v2084_v5  ;;  %705 = vmatprep.mubr.f32.mxu1 %v2084_v5 }
  0x6e   : > { %876 = vperm.xlu1 %1914, %v757_v47   ;;  %871 = vperm.xlu0 %1913, %v756_v48   ;;  %v2412_v48 = vstv %s1261_s23 }
  0x6f   : > { %1844 = vmatmul.mubr.msk.f32.gmra.mxu0 %vm382_vm0, %v359_v49  ;;  %1860 = vmatmul.mubr.msk.f32.gmra.mxu1 %vm382_vm0, %v375_v50 }
  0x70   : > { %615 = vmatprep.mubr.f32.mxu0 %v2084_v5  ;;  %711 = vmatprep.mubr.f32.mxu1 %v2084_v5 }
  0x72   : > { %886 = vperm.xlu1 %1914, %v759_v51   ;;  %881 = vperm.xlu0 %1913, %v758_v52  }
  0x73   : > { %1845 = vmatmul.mubr.msk.f32.gmra.mxu0 %vm382_vm0, %v360_v53  ;;  %1861 = vmatmul.mubr.msk.f32.gmra.mxu1 %vm382_vm0, %v376_v54 }
  0x74   : > { %621 = vmatprep.mubr.f32.mxu0 %v2084_v5  ;;  %717 = vmatprep.mubr.f32.mxu1 %v2084_v5 }
  0x76   : > { %896 = vperm.xlu1 %1914, %v761_v55   ;;  %891 = vperm.xlu0 %1913, %v760_v56  }
  0x77   : > { %1846 = vmatmul.mubr.msk.f32.gmra.mxu0 %vm382_vm0, %v361_v57  ;;  %1862 = vmatmul.mubr.msk.f32.gmra.mxu1 %vm382_vm0, %v377_v58 }
  0x78   : > { %627 = vmatprep.mubr.f32.mxu0 %v2084_v5  ;;  %723 = vmatprep.mubr.f32.mxu1 %v2084_v5 }
  0x7a   : > { %906 = vperm.xlu1 %1914, %v763_v59   ;;  %901 = vperm.xlu0 %1913, %v762_v60  }
  0x7b   : > { %1847 = vmatmul.mubr.msk.f32.gmra.mxu0 %vm382_vm0, %v362_v61  ;;  %1863 = vmatmul.mubr.msk.f32.gmra.mxu1 %vm382_vm0, %v378_v62 }
  0x7c   : > { %633 = vmatprep.mubr.f32.mxu0 %v2084_v5  ;;  %729 = vmatprep.mubr.f32.mxu1 %v2084_v5  ;;  %v930_v5 = vlaneseq }
  0x7e   : > { %916 = vperm.xlu1 %1914, %v765_v63   ;;  %911 = vperm.xlu0 %1913, %v764_v0   ;;  %v931_v14 = vshrl.u32 %v930_v5, 7 }
  0x7f   : > { %1848 = vmatmul.mubr.msk.f32.gmra.mxu0 %vm382_vm0, %v363_v1  ;;  %1864 = vmatmul.mubr.msk.f32.gmra.mxu1 %vm382_vm0, %v379_v2 }
  0x80   : > { %v936_v17 = vsub.s32 1, %v931_v14  ;;  %v932_v18 = vsub.s32 0, %v931_v14 }
  0x82   : > { %926 = vperm.xlu1 %1914, %v767_v3   ;;  %921 = vperm.xlu0 %1913, %v766_v4   ;;  %v2376_v22 = vrot.slane %v768_v19, %v936_v17  ;;  %v2378_v23 = vrot.slane %v768_v19, %v932_v18 }
  0xc1   : > { %v782_v6 = vpop.permute.xlu1 %781  ;;  %v772_v7 = vpop.permute.xlu0 %771 }
  0xc2   : > { %v2407_v46 = vadd.f32 %v2378_v23, %v782_v6  ;;  %v2410_v47 = vadd.f32 %v2376_v22, %v782_v6  ;;  %v2415_v49 = vadd.f32 %v2378_v23, %v772_v7  ;;  %v2418_v50 = vadd.f32 %v2376_v22, %v772_v7 }
  0xc5   : > { %v787_v8 = vpop.permute.xlu1 %786  ;;  %v777_v9 = vpop.permute.xlu0 %776 }
  0xc6   : > { %v2421_v51 = vadd.f32 %v2378_v23, %v787_v8  ;;  %v2424_v52 = vadd.f32 %v2376_v22, %v787_v8  ;;  %v2427_v55 = vadd.f32 %v2378_v23, %v777_v9  ;;  %v2430_v56 = vadd.f32 %v2376_v22, %v777_v9 }
  0xc9   : > { %v797_v10 = vpop.permute.xlu1 %796  ;;  %v792_v11 = vpop.permute.xlu0 %791 }
  0xca   : > { %v2433_v57 = vadd.f32 %v2378_v23, %v797_v10  ;;  %v2436_v58 = vadd.f32 %v2376_v22, %v797_v10  ;;  %v2439_v59 = vadd.f32 %v2378_v23, %v792_v11  ;;  %v2442_v60 = vadd.f32 %v2376_v22, %v792_v11 }
  0xcd   : > { %v807_v12 = vpop.permute.xlu1 %806  ;;  %v802_v13 = vpop.permute.xlu0 %801 }
  0xce   : > { %v2445_v61 = vadd.f32 %v2378_v23, %v807_v12  ;;  %v2448_v62 = vadd.f32 %v2376_v22, %v807_v12  ;;  %v2451_v63 = vadd.f32 %v2378_v23, %v802_v13  ;;  %v2454_v0 = vadd.f32 %v2376_v22, %v802_v13 }
  0xd1   : > { %v817_v15 = vpop.permute.xlu1 %816  ;;  %v812_v16 = vpop.permute.xlu0 %811 }
  0xd2   : > { %v2457_v1 = vadd.f32 %v2378_v23, %v817_v15  ;;  %v2460_v2 = vadd.f32 %v2376_v22, %v817_v15  ;;  %v2463_v3 = vadd.f32 %v2378_v23, %v812_v16  ;;  %v2466_v4 = vadd.f32 %v2376_v22, %v812_v16 }
  0xd5   : > { %v827_v20 = vpop.permute.xlu1 %826  ;;  %v822_v21 = vpop.permute.xlu0 %821 }
  0xd6   : > { %v2469_v6 = vadd.f32 %v2378_v23, %v827_v20  ;;  %v2472_v7 = vadd.f32 %v2376_v22, %v827_v20  ;;  %v2475_v8 = vadd.f32 %v2378_v23, %v822_v21  ;;  %v2478_v9 = vadd.f32 %v2376_v22, %v822_v21 }
  0xd8   : > { %2868 = vst [vmem:[#allocation11_spill] sm:$0xff] %v2469_v6  ;;  %2869 = vst [vmem:[#allocation12_spill] sm:$0xff] %v2472_v7 }
  0xd9   : > { %v837_v24 = vpop.permute.xlu1 %836  ;;  %v832_v25 = vpop.permute.xlu0 %831  ;;  %2870 = vst [vmem:[#allocation13_spill] sm:$0xff] %v2478_v9 }
  0xda   : > { %v2381_v26 = vadd.f32 %v2378_v23, %v837_v24  ;;  %v2384_v27 = vadd.f32 %v2376_v22, %v837_v24  ;;  %v2387_v28 = vadd.f32 %v2378_v23, %v832_v25  ;;  %v2390_v29 = vadd.f32 %v2376_v22, %v832_v25 }
  0xdc   : > { %2860 = vst [vmem:[#allocation3_spill] sm:$0xff] %v2381_v26  ;;  %2861 = vst [vmem:[#allocation4_spill] sm:$0xff] %v2384_v27 }
  0xdd   : > { %2862 = vst [vmem:[#allocation5_spill] sm:$0xff] %v2387_v28  ;;  %2863 = vst [vmem:[#allocation6_spill] sm:$0xff] %v2390_v29  ;;  %v847_v30 = vpop.permute.xlu1 %846  ;;  %v842_v31 = vpop.permute.xlu0 %841 }
  0xde   : > { %v2393_v32 = vadd.f32 %v2378_v23, %v847_v30  ;;  %v2396_v33 = vadd.f32 %v2376_v22, %v847_v30  ;;  %v2399_v34 = vadd.f32 %v2378_v23, %v842_v31  ;;  %v2402_v35 = vadd.f32 %v2376_v22, %v842_v31 }
  0xe0   : > { %2864 = vst [vmem:[#allocation7_spill] sm:$0xff] %v2393_v32  ;;  %2865 = vst [vmem:[#allocation8_spill] sm:$0xff] %v2396_v33 }
  0xe1   : > { %2866 = vst [vmem:[#allocation9_spill] sm:$0xff] %v2399_v34  ;;  %2867 = vst [vmem:[#allocation10_spill] sm:$0xff] %v2402_v35  ;;  %v857_v36 = vpop.permute.xlu1 %856  ;;  %v852_v37 = vpop.permute.xlu0 %851 }
  0xe2   : > { %v2481_v10 = vadd.f32 %v2378_v23, %v857_v36  ;;  %v2484_v11 = vadd.f32 %v2376_v22, %v857_v36  ;;  %v972_v5 = vadd.f32 %v2378_v23, %v852_v37  ;;  %v973_v12 = vadd.f32 %v2376_v22, %v852_v37 }
  0xe5   : > { %v867_v38 = vpop.permute.xlu1 %866  ;;  %v862_v39 = vpop.permute.xlu0 %861 }
  0xe6   : > { %v2489_v13 = vadd.f32 %v2378_v23, %v867_v38  ;;  %v2492_v14 = vadd.f32 %v2376_v22, %v867_v38  ;;  %v2495_v17 = vadd.f32 %v2378_v23, %v862_v39  ;;  %v2498_v18 = vadd.f32 %v2376_v22, %v862_v39 }
  0xe9   : > { %v877_v40 = vpop.permute.xlu1 %876  ;;  %v872_v41 = vpop.permute.xlu0 %871 }
  0xea   : > { %v2501_v19 = vadd.f32 %v2378_v23, %v877_v40  ;;  %v2504_v20 = vadd.f32 %v2376_v22, %v877_v40  ;;  %v2507_v21 = vadd.f32 %v2378_v23, %v872_v41  ;;  %v2510_v24 = vadd.f32 %v2376_v22, %v872_v41 }
  0xed   : > { %v887_v42 = vpop.permute.xlu1 %886  ;;  %v882_v43 = vpop.permute.xlu0 %881 }
  0xee   : > { %v2513_v25 = vadd.f32 %v2378_v23, %v887_v42  ;;  %v2516_v30 = vadd.f32 %v2376_v22, %v887_v42  ;;  %v2519_v31 = vadd.f32 %v2378_v23, %v882_v43  ;;  %v2522_v36 = vadd.f32 %v2376_v22, %v882_v43 }
  0xf1   : > { %v897_v44 = vpop.permute.xlu1 %896  ;;  %v892_v45 = vpop.permute.xlu0 %891 }
  0xf2   : > { %v2525_v37 = vadd.f32 %v2378_v23, %v897_v44  ;;  %v2528_v38 = vadd.f32 %v2376_v22, %v897_v44  ;;  %v2531_v41 = vadd.f32 %v2378_v23, %v892_v45  ;;  %v2534_v42 = vadd.f32 %v2376_v22, %v892_v45 }
  0xf5   : > { %v907_v53 = vpop.permute.xlu1 %906  ;;  %v902_v54 = vpop.permute.xlu0 %901 }
  0xf6   : > { %v2537_v35 = vadd.f32 %v2378_v23, %v907_v53  ;;  %v2540_v43 = vadd.f32 %v2376_v22, %v907_v53  ;;  %v2543_v34 = vadd.f32 %v2378_v23, %v902_v54  ;;  %v2546_v44 = vadd.f32 %v2376_v22, %v902_v54 }
  0xf8   : > { %2871 = vst [vmem:[#allocation14_spill] sm:$0xff] %v2537_v35  ;;  %2872 = vst [vmem:[#allocation15_spill] sm:$0xff] %v2540_v43 }
  0xf9   : > { %v917_v15 = vpop.permute.xlu1 %916  ;;  %v912_v16 = vpop.permute.xlu0 %911  ;;  %2873 = vst [vmem:[#allocation16_spill] sm:$0xff] %v2546_v44 }
  0xfa   : > { %v2552_v35 = vadd.f32 %v2378_v23, %v917_v15  ;;  %v2555_v53 = vadd.f32 %v2376_v22, %v917_v15  ;;  %v2558_v43 = vadd.f32 %v2378_v23, %v912_v16  ;;  %v2561_v54 = vadd.f32 %v2376_v22, %v912_v16 }
  0xfc   : > { %2875 = vst [vmem:[#allocation18_spill] sm:$0xff] %v2552_v35  ;;  %2876 = vst [vmem:[#allocation19_spill] sm:$0xff] %v2555_v53 }
  0xfd   : > { %v2549_v28 = vpop.permute.xlu1 %926  ;;  %2877 = vst [vmem:[#allocation20_spill] sm:$0xff] %v2558_v43  ;;  %2878 = vst [vmem:[#allocation21_spill] sm:$0xff] %v2561_v54 }
  0xfe   : > { %2874 = vst [vmem:[#allocation17_spill] sm:$0xff] %v2549_v28 }
 0x103   : > { %v545_v39 = vpop.f32.mrf.mxu0  ;;  %v641_v40 = vpop.f32.mrf.mxu1 }
 0x104   : > { %v1004_v33 = vmul.f32 2.0, %v545_v39  ;;  %v1036_v32 = vmul.f32 2.0, %v641_v40  ;;  %v922_v39 = vpop.permute.xlu0 %921 }
 0x105   : > { %v547_v27 = vpop.f32.mrf.mxu0  ;;  %v643_v26 = vpop.f32.mrf.mxu1  ;;  %v2569_v15 = vadd.f32 %v2378_v23, %v922_v39 }
 0x106   : > { %v1068_v29 = vsub.f32 %v2415_v49, %v1004_v33  ;;  %v1100_v45 = vsub.f32 %v972_v5, %v1036_v32  ;;  %v1005_v40 = vmul.f32 2.0, %v547_v27  ;;  %v1037_v7 = vmul.f32 2.0, %v643_v26 }
 0x107   : > { %v551_v6 = vpop.f32.mrf.mxu0  ;;  %v647_v33 = vpop.f32.mrf.mxu1  ;;  %v2566_v26 = vadd.f32 %v2378_v23, %v2549_v28 }
 0x108   : > { %v1132_v32 = vadd.f32 1.0, %v1068_v29  ;;  %v1164_v49 = vadd.f32 1.0, %v1100_v45  ;;  %v1069_v5 = vsub.f32 %v2418_v50, %v1005_v40  ;;  %v1101_v27 = vsub.f32 %v973_v12, %v1037_v7 }
 0x109   : > { %v1006_v53 = vmul.f32 2.0, %v551_v6  ;;  %v1038_v35 = vmul.f32 2.0, %v647_v33  ;;  %v553_v43 = vpop.f32.mrf.mxu0  ;;  %v649_v44 = vpop.f32.mrf.mxu1 }
 0x10a   : > { %1915 = vrcp.f32 %v1132_v32  ;;  %v1133_v16 = vadd.f32 1.0, %v1069_v5  ;;  %v1165_v54 = vadd.f32 1.0, %v1101_v27  ;;  %v1007_v9 = vmul.f32 2.0, %v553_v43 }
 0x10b   : > { %1917 = vrcp.f32 %v1164_v49  ;;  %v1070_v29 = vsub.f32 %v2427_v55, %v1006_v53  ;;  %v1102_v50 = vsub.f32 %v2481_v10, %v1038_v35  ;;  %v1039_v7 = vmul.f32 2.0, %v649_v44  ;;  %v557_v12 = vpop.f32.mrf.mxu0  ;;  %v653_v45 = vpop.f32.mrf.mxu1 }
 0x10c   : > { %1919 = vrcp.f32 %v1133_v16  ;;  %v1071_v23 = vsub.f32 %v2430_v56, %v1007_v9  ;;  %v1008_v40 = vmul.f32 2.0, %v557_v12  ;;  %v1040_v6 = vmul.f32 2.0, %v653_v45 }
 0x10d   : > { %1921 = vrcp.f32 %v1165_v54  ;;  %v1134_v33 = vadd.f32 1.0, %v1070_v29  ;;  %v1166_v28 = vadd.f32 1.0, %v1102_v50  ;;  %v1103_v32 = vsub.f32 %v2484_v11, %v1039_v7  ;;  %v559_v5 = vpop.f32.mrf.mxu0  ;;  %v655_v43 = vpop.f32.mrf.mxu1 }
 0x10e   : > { %v1135_v49 = vadd.f32 1.0, %v1071_v23  ;;  %v1072_v55 = vsub.f32 %v2407_v46, %v1008_v40  ;;  %v1104_v35 = vsub.f32 %v2495_v17, %v1040_v6  ;;  %v1009_v10 = vmul.f32 2.0, %v559_v5 }
 0x10f   : > { %v2578_v44 = vadd.f32 %v2376_v22, %v922_v39  ;;  %1923 = vrcp.f32 %v1134_v33  ;;  %v1167_v56 = vadd.f32 1.0, %v1103_v32  ;;  %v1041_v9 = vmul.f32 2.0, %v655_v43  ;;  %v563_v53 = vpop.f32.mrf.mxu0  ;;  %v659_v54 = vpop.f32.mrf.mxu1 }
 0x110   : > { %1925 = vrcp.f32 %v1166_v28  ;;  %v1136_v27 = vadd.f32 1.0, %v1072_v55  ;;  %v1168_v16 = vadd.f32 1.0, %v1104_v35  ;;  %v1073_v11 = vsub.f32 %v2410_v47, %v1009_v10 }
 0x111   : > { %1927 = vrcp.f32 %v1135_v49  ;;  %v1105_v29 = vsub.f32 %v2498_v18, %v1041_v9  ;;  %v1010_v46 = vmul.f32 2.0, %v563_v53  ;;  %v1042_v50 = vmul.f32 2.0, %v659_v54  ;;  %v565_v17 = vpop.f32.mrf.mxu0  ;;  %v661_v7 = vpop.f32.mrf.mxu1  ;;  %v1262_v9 = vld [vmem:[#allocation2 + $0xb0] sm:$0xff] }
 0x112   : > { %1929 = vrcp.f32 %v1167_v56  ;;  %v1137_v39 = vadd.f32 1.0, %v1073_v11  ;;  %v1011_v12 = vmul.f32 2.0, %v565_v17  ;;  %v1043_v45 = vmul.f32 2.0, %v661_v7 }
 0x113   : > { %1931 = vrcp.f32 %v1136_v27  ;;  %v1169_v23 = vadd.f32 1.0, %v1105_v29  ;;  %v1074_v40 = vsub.f32 %v2421_v51, %v1010_v46  ;;  %v1106_v28 = vsub.f32 %v2489_v13, %v1042_v50  ;;  %v569_v6 = vpop.f32.mrf.mxu0  ;;  %v665_v33 = vpop.f32.mrf.mxu1  ;;  %v1294_v29 = vld [vmem:[#allocation2 + $0x148] sm:$0xff] }
 0x114   : > { %1933 = vrcp.f32 %v1168_v16  ;;  %v1075_v47 = vsub.f32 %v2424_v52, %v1011_v12  ;;  %v1107_v18 = vsub.f32 %v2492_v14, %v1043_v45  ;;  %v1012_v32 = vmul.f32 2.0, %v569_v6  ;;  %v1295_v6 = vld [vmem:[#allocation2 + $0x1d0] sm:$0xff] }
 0x115   : > { %1935 = vrcp.f32 %v1137_v39  ;;  %v1138_v5 = vadd.f32 1.0, %v1074_v40  ;;  %v1170_v43 = vadd.f32 1.0, %v1106_v28  ;;  %v1044_v49 = vmul.f32 2.0, %v665_v33  ;;  %v571_v55 = vpop.f32.mrf.mxu0  ;;  %v667_v35 = vpop.f32.mrf.mxu1 }
 0x116   : > { %1937 = vrcp.f32 %v1169_v23  ;;  %v1139_v10 = vadd.f32 1.0, %v1075_v47  ;;  %v1171_v56 = vadd.f32 1.0, %v1107_v18  ;;  %v1076_v51 = vsub.f32 %v2439_v59, %v1012_v32  ;;  %v1263_v59 = vld [vmem:[#allocation2 + $0x1b0] sm:$0xff] }
 0x117   : > { %v1916_v13 = vpop.eup %1915  ;;  %1939 = vrcp.f32 %v1138_v5  ;;  %v1108_v53 = vsub.f32 %v2507_v21, %v1044_v49  ;;  %v1013_v52 = vmul.f32 2.0, %v571_v55  ;;  %v1045_v54 = vmul.f32 2.0, %v667_v35  ;;  %v575_v14 = vpop.f32.mrf.mxu0  ;;  %v1264_v55 = vld [vmem:[#allocation2 + $0xd8] sm:$0xff] }
 0x118   : > { %v671_v27 = vpop.f32.mrf.mxu1  ;;  %v1918_v16 = vpop.eup %1917  ;;  %v1327_v11 = vmul.f32 %v1916_v13, %v2412_v48  ;;  %1941 = vrcp.f32 %v1170_v43  ;;  %v1140_v46 = vadd.f32 1.0, %v1076_v51  ;;  %v1014_v50 = vmul.f32 2.0, %v575_v14  ;;  %v1296_v13 = vld [vmem:[#allocation2 + $0x100] sm:$0xff] }
 0x119   : > { %v1920_v17 = vpop.eup %1919  ;;  %v1359_v7 = vmul.f32 %v1918_v16, %v2412_v48  ;;  %1943 = vrcp.f32 %v1139_v10  ;;  %v1172_v39 = vadd.f32 1.0, %v1108_v53  ;;  %v1077_v12 = vsub.f32 %v2442_v60, %v1013_v52  ;;  %v577_v21 = vpop.f32.mrf.mxu0  ;;  %v1265_v16 = vld [vmem:[#allocation2 + $0x18] sm:$0xff] }
 0x11a   : > { %v673_v45 = vpop.f32.mrf.mxu1  ;;  %v1922_v23 = vpop.eup %1921  ;;  %v1391_v40 = vadd.f32 %v1327_v11, %v1262_v9  ;;  %v1328_v28 = vmul.f32 %v1920_v17, %v2412_v48  ;;  %1945 = vrcp.f32 %v1171_v56  ;;  %v1109_v33 = vsub.f32 %v2510_v24, %v1045_v54  ;;  %v1297_v17 = vld [vmem:[#allocation2 + $0xc8] sm:$0xff] }
 0x11b   : > { %v1423_v47 = vadd.f32 %v1359_v7, %v1294_v29  ;;  %v1360_v18 = vmul.f32 %v1922_v23, %v2412_v48  ;;  %1947 = vrcp.f32 %v1140_v46  ;;  %v1141_v32 = vadd.f32 1.0, %v1077_v12  ;;  %v581_v5 = vpop.f32.mrf.mxu0 }
 0x11c   : > { %v2594_v43 = vpop.f32.mrf.mxu1  ;;  %v1924_v49 = vpop.eup %1923  ;;  %1455 = vst [vmem:[#allocation2 + $0xb0] sm:$0xff] %v1391_v40  ;;  %v1392_v60 = vadd.f32 %v1328_v28, %v1263_v59  ;;  %1949 = vrcp.f32 %v1172_v39  ;;  %v1173_v35 = vadd.f32 1.0, %v1109_v33  ;;  %v1078_v10 = vsub.f32 %v2433_v57, %v1014_v50  ;;  %v1266_v28 = vld [vmem:[#allocation2 + $0x50] sm:$0xff] }
 0x11d   : > { %v1926_v51 = vpop.eup %1925  ;;  %1487 = vst [vmem:[#allocation2 + $0x148] sm:$0xff] %v1423_v47  ;;  %v1424_v56 = vadd.f32 %v1360_v18, %v1295_v6  ;;  %v1329_v24 = vmul.f32 %v1924_v49, %v2412_v48  ;;  %1951 = vrcp.f32 %v1141_v32  ;;  %v1046_v9 = vmul.f32 2.0, %v671_v27  ;;  %v2598_v53 = vpop.f32.mrf.mxu0  ;;  %v1298_v18 = vld [vmem:[#allocation2 + $0x40] sm:$0xff] }
 0x11e   : > { %v2600_v52 = vpop.f32.mrf.mxu1  ;;  %v1928_v54 = vpop.eup %1927  ;;  %1456 = vst [vmem:[#allocation2 + $0x1b0] sm:$0xff] %v1392_v60  ;;  %v1361_v14 = vmul.f32 %v1926_v51, %v2412_v48  ;;  %1953 = vrcp.f32 %v1173_v35  ;;  %v1142_v11 = vadd.f32 1.0, %v1078_v10  ;;  %v1015_v57 = vmul.f32 2.0, %v577_v21  ;;  %v1267_v10 = vld [vmem:[#allocation2 + $0x168] sm:$0xff] }
 0x11f   : > { %v1930_v29 = vpop.eup %1929  ;;  %1488 = vst [vmem:[#allocation2 + $0x1d0] sm:$0xff] %v1424_v56  ;;  %v1393_v46 = vadd.f32 %v1329_v24, %v1264_v55  ;;  %v1330_v50 = vmul.f32 %v1928_v54, %v2412_v48  ;;  %v1110_v27 = vsub.f32 %v2501_v19, %v1046_v9  ;;  %v1047_v7 = vmul.f32 2.0, %v673_v45  ;;  %v2605_v59 = vpop.f32.mrf.mxu0  ;;  %v1299_v9 = vld [vmem:[#allocation2 + $0x1f8] sm:$0xff] }
 0x120   : > { %v2607_v39 = vpop.f32.mrf.mxu1  ;;  %v1932_v12 = vpop.eup %1931  ;;  %v1425_v23 = vadd.f32 %v1361_v14, %v1296_v13  ;;  %v1362_v40 = vmul.f32 %v1930_v29, %v2412_v48  ;;  %1955 = vrcp.f32 %v1142_v11  ;;  %v1079_v21 = vsub.f32 %v2436_v58, %v1015_v57  ;;  %v1268_v29 = vld [vmem:[#allocation2 + $0x130] sm:$0xff] }
 0x121   : > { %v1934_v6 = vpop.eup %1933  ;;  %1457 = vst [vmem:[#allocation2 + $0xd8] sm:$0xff] %v1393_v46  ;;  %v1394_v33 = vadd.f32 %v1330_v50, %v1265_v16  ;;  %v1331_v47 = vmul.f32 %v1932_v12, %v2412_v48  ;;  %v1174_v19 = vadd.f32 1.0, %v1110_v27  ;;  %v1111_v45 = vsub.f32 %v2504_v20, %v1047_v7  ;;  %v2613_v32 = vpop.f32.mrf.mxu0  ;;  %v1300_v27 = vld [vmem:[#allocation2 + $0x20] sm:$0xff] }
 0x122   : > { %v2615_v49 = vpop.f32.mrf.mxu1  ;;  %v1936_v60 = vpop.eup %1935  ;;  %1489 = vst [vmem:[#allocation2 + $0x100] sm:$0xff] %v1425_v23  ;;  %v1426_v55 = vadd.f32 %v1362_v40, %v1297_v17  ;;  %v1363_v35 = vmul.f32 %v1934_v6, %v2412_v48  ;;  %v1143_v58 = vadd.f32 1.0, %v1079_v21  ;;  %v1016_v51 = vmul.f32 2.0, %v581_v5  ;;  %v1269_v6 = vld [vmem:[#allocation2 + $0x48] sm:$0xff] }
 0x123   : > { %v1938_v56 = vpop.eup %1937  ;;  %1458 = vst [vmem:[#allocation2 + $0x18] sm:$0xff] %v1394_v33  ;;  %v1395_v24 = vadd.f32 %v1331_v47, %v1266_v28  ;;  %v1332_v13 = vmul.f32 %v1936_v60, %v2412_v48  ;;  %1957 = vrcp.f32 %v1174_v19  ;;  %v1175_v20 = vadd.f32 1.0, %v1111_v45  ;;  %v2619_v54 = vpop.f32.mrf.mxu0  ;;  %v1301_v45 = vld [vmem:[#allocation2 + $0x128] sm:$0xff] }
 0x124   : > { %v2621_v14 = vpop.f32.mrf.mxu1  ;;  %v1940_v16 = vpop.eup %1939  ;;  %1490 = vst [vmem:[#allocation2 + $0xc8] sm:$0xff] %v1426_v55  ;;  %v1427_v11 = vadd.f32 %v1363_v35, %v1298_v18  ;;  %v1364_v57 = vmul.f32 %v1938_v56, %v2412_v48  ;;  %1959 = vrcp.f32 %v1143_v58  ;;  %v1080_v5 = vsub.f32 %v2451_v63, %v1016_v51 }
 0x125   : > { %v1942_v46 = vpop.eup %1941  ;;  %1459 = vst [vmem:[#allocation2 + $0x50] sm:$0xff] %v1395_v24  ;;  %v1396_v50 = vadd.f32 %v1332_v13, %v1267_v10  ;;  %v1333_v17 = vmul.f32 %v1940_v16, %v2412_v48  ;;  %1961 = vrcp.f32 %v1175_v20  ;;  %v1048_v7 = vmul.f32 2.0, %v2594_v43  ;;  %v2627_v12 = vpop.f32.mrf.mxu0 }
 0x126   : > { %v2629_v23 = vpop.f32.mrf.mxu1  ;;  %v1944_v40 = vpop.eup %1943  ;;  %1491 = vst [vmem:[#allocation2 + $0x40] sm:$0xff] %v1427_v11  ;;  %v1428_v28 = vadd.f32 %v1364_v57, %v1299_v9  ;;  %v1365_v21 = vmul.f32 %v1942_v46, %v2412_v48  ;;  %v1144_v63 = vadd.f32 1.0, %v1080_v5  ;;  %v1017_v33 = vmul.f32 2.0, %v2598_v53  ;;  %v1270_v53 = vld [vmem:[#allocation2 + $0x180] sm:$0xff]  ;;  %v1271_v46 = vld [vmem:[#allocation2 + $0x110] sm:$0xff] }
 0x127   : > { %v1946_v47 = vpop.eup %1945  ;;  %1460 = vst [vmem:[#allocation2 + $0x168] sm:$0xff] %v1396_v50  ;;  %v1397_v18 = vadd.f32 %v1333_v17, %v1268_v29  ;;  %v1334_v19 = vmul.f32 %v1944_v40, %v2412_v48  ;;  %v1112_v43 = vsub.f32 %v2519_v31, %v1048_v7  ;;  %v1049_v60 = vmul.f32 2.0, %v2600_v52  ;;  %v2636_v55 = vpop.f32.mrf.mxu0  ;;  %v1302_v9 = vld [vmem:[#allocation2 + $0x1a0] sm:$0xff]  ;;  %v1303_v40 = vld [vmem:[#allocation2 + $0x1f0] sm:$0xff] }
 0x128   : > { %v2638_v35 = vpop.f32.mrf.mxu1  ;;  %v1948_v10 = vpop.eup %1947  ;;  %1492 = vst [vmem:[#allocation2 + $0x1f8] sm:$0xff] %v1428_v28  ;;  %v1429_v58 = vadd.f32 %v1365_v21, %v1300_v27  ;;  %v1366_v51 = vmul.f32 %v1946_v47, %v2412_v48  ;;  %1963 = vrcp.f32 %v1144_v63  ;;  %v1081_v56 = vsub.f32 %v2454_v0, %v1017_v33  ;;  %v1272_v47 = vld [vmem:[#allocation2 + $0x118] sm:$0xff] }
 0x129   : > { %v1950_v24 = vpop.eup %1949  ;;  %1461 = vst [vmem:[#allocation2 + $0x130] sm:$0xff] %v1397_v18  ;;  %v1398_v13 = vadd.f32 %v1334_v19, %v1269_v6  ;;  %v1335_v31 = vmul.f32 %v1948_v10, %v2412_v48  ;;  %v1176_v52 = vadd.f32 1.0, %v1112_v43  ;;  %v1113_v20 = vsub.f32 %v2522_v36, %v1049_v60  ;;  %v2644_v16 = vpop.f32.mrf.mxu0 }
 0x12a   : > { %v2646_v11 = vpop.f32.mrf.mxu1  ;;  %v1952_v57 = vpop.eup %1951  ;;  %1493 = vst [vmem:[#allocation2 + $0x20] sm:$0xff] %v1429_v58  ;;  %v1430_v29 = vadd.f32 %v1366_v51, %v1301_v45  ;;  %v1367_v5 = vmul.f32 %v1950_v24, %v2412_v48  ;;  %v1145_v0 = vadd.f32 1.0, %v1081_v56  ;;  %v1018_v50 = vmul.f32 2.0, %v2605_v59  ;;  %v1304_v24 = vld [vmem:[#allocation2 + $0xe8] sm:$0xff] }
 0x12b   : > { %v1954_v17 = vpop.eup %1953  ;;  %1462 = vst [vmem:[#allocation2 + $0x48] sm:$0xff] %v1398_v13  ;;  %v1399_v27 = vadd.f32 %v1335_v31, %v1270_v53  ;;  %v1336_v7 = vmul.f32 %v1952_v57, %v2412_v48  ;;  %1965 = vrcp.f32 %v1176_v52  ;;  %v1177_v36 = vadd.f32 1.0, %v1113_v20  ;;  %v2653_v63 = vpop.f32.mrf.mxu0  ;;  %v1273_v52 = vld [vmem:[#allocation2 + $0x98] sm:$0xff] }
 0x12c   : > { %1494 = vst [vmem:[#allocation2 + $0x128] sm:$0xff] %v1430_v29  ;;  %v1431_v28 = vadd.f32 %v1367_v5, %v1302_v9  ;;  %v1368_v21 = vmul.f32 %v1954_v17, %v2412_v48  ;;  %1967 = vrcp.f32 %v1145_v0  ;;  %v1082_v6 = vsub.f32 %v2445_v61, %v1018_v50  ;;  %v2657_v45 = vpop.f32.mrf.mxu1  ;;  %v1305_v5 = vld [vmem:[#allocation2 + $0x78] sm:$0xff] }
 0x12d   : > { %v1956_v33 = vpop.eup %1955  ;;  %1463 = vst [vmem:[#allocation2 + $0x180] sm:$0xff] %v1399_v27  ;;  %v1400_v59 = vadd.f32 %v1336_v7, %v1271_v46  ;;  %1969 = vrcp.f32 %v1177_v36  ;;  %v1050_v18 = vmul.f32 2.0, %v2607_v39  ;;  %v1019_v19 = vmul.f32 2.0, %v2613_v32  ;;  %v2667_v9 = vpop.f32.mrf.mxu0 }
 0x12e   : > { %1495 = vst [vmem:[#allocation2 + $0x1a0] sm:$0xff] %v1431_v28  ;;  %v1432_v43 = vadd.f32 %v1368_v21, %v1303_v40  ;;  %v1337_v60 = vmul.f32 %v1956_v33, %v2412_v48  ;;  %v1146_v10 = vadd.f32 1.0, %v1082_v6  ;;  %v1051_v61 = vmul.f32 2.0, %v2615_v49  ;;  %v1274_v21 = vld [vmem:[#allocation2 + $0x120] sm:$0xff] }
 0x12f   : > { %1464 = vst [vmem:[#allocation2 + $0x110] sm:$0xff] %v1400_v59  ;;  %v1114_v58 = vsub.f32 %v2513_v25, %v1050_v18  ;;  %v1083_v51 = vsub.f32 %v2448_v62, %v1019_v19  ;;  %v1020_v53 = vmul.f32 2.0, %v2619_v54  ;;  %v1052_v39 = vmul.f32 2.0, %v2621_v14  ;;  %v2671_v14 = vpop.f32.mrf.mxu1  ;;  %v2677_v40 = vpop.f32.mrf.mxu0 }
 0x130   : > { %v1958_v56 = vpop.eup %1957  ;;  %1496 = vst [vmem:[#allocation2 + $0x1f0] sm:$0xff] %v1432_v43  ;;  %v1401_v32 = vadd.f32 %v1337_v60, %v1272_v47  ;;  %1971 = vrcp.f32 %v1146_v10  ;;  %v1115_v13 = vsub.f32 %v2516_v30, %v1051_v61  ;;  %v1021_v31 = vmul.f32 2.0, %v2627_v12  ;;  %v1306_v60 = vld [vmem:[#allocation2 + $0x70] sm:$0xff] }
 0x131   : > { %v1960_v49 = vpop.eup %1959  ;;  %v1369_v25 = vmul.f32 %v1958_v56, %v2412_v48  ;;  %v1178_v62 = vadd.f32 1.0, %v1114_v58  ;;  %v1147_v20 = vadd.f32 1.0, %v1083_v51  ;;  %v1084_v54 = vsub.f32 %v2463_v3, %v1020_v53  ;;  %v2681_v6 = vpop.f32.mrf.mxu1  ;;  %v1275_v51 = vld [vmem:[#allocation2 + $0x150] sm:$0xff] }
 0x132   : > { %v1962_v57 = vpop.eup %1961  ;;  %1465 = vst [vmem:[#allocation2 + $0x118] sm:$0xff] %v1401_v32  ;;  %v1338_v29 = vmul.f32 %v1960_v49, %v2412_v48  ;;  %v1179_v30 = vadd.f32 1.0, %v1115_v13  ;;  %v1116_v12 = vsub.f32 %v2531_v41, %v1052_v39  ;;  %v1085_v46 = vsub.f32 %v2466_v4, %v1021_v31  ;;  %v613_v58 = vpop.f32.mrf.mxu0  ;;  %v1307_v32 = vld [vmem:[#allocation2 + $0x90] sm:$0xff] }
 0x133   : > { %v1433_v0 = vadd.f32 %v1369_v25, %v1304_v24  ;;  %v1370_v50 = vmul.f32 %v1962_v57, %v2412_v48  ;;  %1973 = vrcp.f32 %v1178_v62  ;;  %v1148_v17 = vadd.f32 1.0, %v1084_v54  ;;  %v1276_v57 = vld [vmem:[#allocation2 + $0x108] sm:$0xff] }
 0x134   : > { %v1402_v27 = vadd.f32 %v1338_v29, %v1273_v52  ;;  %1975 = vrcp.f32 %v1147_v20  ;;  %v1180_v3 = vadd.f32 1.0, %v1116_v12  ;;  %v1149_v7 = vadd.f32 1.0, %v1085_v46  ;;  %v2700_v62 = vpop.f32.mrf.mxu0 }
 0x135   : > { %v1964_v36 = vpop.eup %1963  ;;  %1497 = vst [vmem:[#allocation2 + $0xe8] sm:$0xff] %v1433_v0  ;;  %v1434_v28 = vadd.f32 %v1370_v50, %v1305_v5  ;;  %1977 = vrcp.f32 %v1179_v30  ;;  %v1053_v41 = vmul.f32 2.0, %v2629_v23  ;;  %v1022_v4 = vmul.f32 2.0, %v2636_v55  ;;  %v2880_v0 = vld [vmem:[#allocation16_spill] sm:$0xff] }
 0x136   : > { %1466 = vst [vmem:[#allocation2 + $0x98] sm:$0xff] %v1402_v27  ;;  %v1339_v33 = vmul.f32 %v1964_v36, %v2412_v48  ;;  %1979 = vrcp.f32 %v1148_v17  ;;  %v1054_v59 = vmul.f32 2.0, %v2638_v35  ;;  %v1023_v47 = vmul.f32 2.0, %v2644_v16  ;;  %v619_v36 = vpop.f32.mrf.mxu0 }
 0x137   : > { %1498 = vst [vmem:[#allocation2 + $0x78] sm:$0xff] %v1434_v28  ;;  %1981 = vrcp.f32 %v1180_v3  ;;  %v1117_v18 = vsub.f32 %v2534_v42, %v1053_v41  ;;  %v1086_v19 = vsub.f32 %v2457_v1, %v1022_v4  ;;  %v1055_v23 = vmul.f32 2.0, %v2646_v11  ;;  %v2693_v1 = vpop.f32.mrf.mxu1  ;;  %v1308_v3 = vld [vmem:[#allocation2 + $0x1d8] sm:$0xff] }
 0x138   : > { %v1966_v43 = vpop.eup %1965  ;;  %v1403_v55 = vadd.f32 %v1339_v33, %v1274_v21  ;;  %1983 = vrcp.f32 %v1149_v7  ;;  %v1118_v10 = vsub.f32 %v2525_v37, %v1054_v59  ;;  %v1087_v61 = vsub.f32 %v2460_v2, %v1023_v47  ;;  %v2881_v33 = vld [vmem:[#allocation11_spill] sm:$0xff] }
 0x139   : > { %v1968_v35 = vpop.eup %1967  ;;  %v1371_v16 = vmul.f32 %v1966_v43, %v2412_v48  ;;  %v1181_v53 = vadd.f32 1.0, %v1117_v18  ;;  %v1150_v39 = vadd.f32 1.0, %v1086_v19  ;;  %v1119_v42 = vsub.f32 %v2528_v38, %v1055_v23  ;;  %v713_v5 = vpop.f32.mrf.mxu1  ;;  %v1309_v19 = vld [vmem:[#allocation2 + $0xd0] sm:$0xff]  ;;  %v2882_v23 = vld [vmem:[#allocation14_spill] sm:$0xff] }
 0x13a   : > { %v1970_v11 = vpop.eup %1969  ;;  %1467 = vst [vmem:[#allocation2 + $0x120] sm:$0xff] %v1403_v55  ;;  %v1340_v56 = vmul.f32 %v1968_v35, %v2412_v48  ;;  %v1182_v24 = vadd.f32 1.0, %v1118_v10  ;;  %v1151_v37 = vadd.f32 1.0, %v1087_v61  ;;  %v1024_v2 = vmul.f32 2.0, %v2653_v63  ;;  %v1278_v61 = vld [vmem:[#allocation2 + $0xe0] sm:$0xff] }
 0x13b   : > { %v1435_v13 = vadd.f32 %v1371_v16, %v1306_v60  ;;  %v1372_v31 = vmul.f32 %v1970_v11, %v2412_v48  ;;  %1985 = vrcp.f32 %v1181_v53  ;;  %v1183_v49 = vadd.f32 1.0, %v1119_v42  ;;  %v715_v47 = vpop.f32.mrf.mxu1  ;;  %v2716_v11 = vpop.f32.mrf.mxu0 }
 0x13c   : > { %v1404_v25 = vadd.f32 %v1340_v56, %v1275_v51  ;;  %1987 = vrcp.f32 %v1150_v39  ;;  %v1088_v38 = vsub.f32 %v2475_v8, %v1024_v2  ;;  %v1056_v52 = vmul.f32 2.0, %v2657_v45  ;;  %v2879_v45 = vld [vmem:[#allocation13_spill] sm:$0xff]  ;;  %v1310_v39 = vld [vmem:[#allocation2 + $0xb8] sm:$0xff] }
 0x13d   : > { %v1972_v20 = vpop.eup %1971  ;;  %1499 = vst [vmem:[#allocation2 + $0x70] sm:$0xff] %v1435_v13  ;;  %v1436_v54 = vadd.f32 %v1372_v31, %v1307_v32  ;;  %1989 = vrcp.f32 %v1182_v24  ;;  %v1025_v63 = vmul.f32 2.0, %v2667_v9  ;;  %v1057_v29 = vmul.f32 2.0, %v2671_v14  ;;  %v1279_v24 = vld [vmem:[#allocation2 + $0x188] sm:$0xff]  ;;  %v2720_v13 = vpop.f32.mrf.mxu1 }
 0x13e   : > { %1468 = vst [vmem:[#allocation2 + $0x150] sm:$0xff] %v1404_v25  ;;  %v1341_v30 = vmul.f32 %v1972_v20, %v2412_v48  ;;  %1991 = vrcp.f32 %v1151_v37  ;;  %v1152_v12 = vadd.f32 1.0, %v1088_v38  ;;  %v1120_v8 = vsub.f32 %v2543_v34, %v1056_v52  ;;  %v1277_v34 = vld [vmem:[#allocation2 + $0x60] sm:$0xff]  ;;  %v2883_v37 = vld [vmem:[#allocation12_spill] sm:$0xff] }
 0x13f   : > { %1500 = vst [vmem:[#allocation2 + $0x90] sm:$0xff] %v1436_v54  ;;  %1993 = vrcp.f32 %v1183_v49  ;;  %v1089_v46 = vsub.f32 %v2879_v45, %v1025_v63  ;;  %v1121_v50 = vsub.f32 %v2880_v0, %v1057_v29  ;;  %v1026_v17 = vmul.f32 2.0, %v2677_v40  ;;  %v1311_v29 = vld [vmem:[#allocation2 + $0x88] sm:$0xff] }
 0x140   : > { %v1974_v27 = vpop.eup %1973  ;;  %v1405_v9 = vadd.f32 %v1341_v30, %v1276_v57  ;;  %1995 = vrcp.f32 %v1152_v12  ;;  %v1184_v14 = vadd.f32 1.0, %v1120_v8  ;;  %v1058_v7 = vmul.f32 2.0, %v2681_v6  ;;  %v2884_v30 = vld [vmem:[#allocation15_spill] sm:$0xff] }
 0x141   : > { %v1976_v28 = vpop.eup %1975  ;;  %v1373_v21 = vmul.f32 %v1974_v27, %v2412_v48  ;;  %v1153_v41 = vadd.f32 1.0, %v1089_v46  ;;  %v1185_v4 = vadd.f32 1.0, %v1121_v50  ;;  %v1090_v59 = vsub.f32 %v2881_v33, %v1026_v17  ;;  %v625_v46 = vpop.f32.mrf.mxu0  ;;  %v2885_v17 = vld [vmem:[#allocation5_spill] sm:$0xff] }
 0x142   : > { %v1978_v18 = vpop.eup %1977  ;;  %1469 = vst [vmem:[#allocation2 + $0x108] sm:$0xff] %v1405_v9  ;;  %v1342_v40 = vmul.f32 %v1976_v28, %v2412_v48  ;;  %1997 = vrcp.f32 %v1184_v14  ;;  %v1122_v43 = vsub.f32 %v2882_v23, %v1058_v7  ;;  %v1027_v55 = vmul.f32 2.0, %v613_v58  ;;  %v2886_v9 = vld [vmem:[#allocation20_spill] sm:$0xff] }
 0x143   : > { %v1980_v6 = vpop.eup %1979  ;;  %v1437_v60 = vadd.f32 %v1373_v21, %v1308_v3  ;;  %v1374_v10 = vmul.f32 %v1978_v18, %v2412_v48  ;;  %1999 = vrcp.f32 %v1153_v41  ;;  %v1154_v35 = vadd.f32 1.0, %v1090_v59  ;;  %v1312_v7 = vld [vmem:[#allocation2 + $0xa8] sm:$0xff] }
 0x144   : > { %v1982_v16 = vpop.eup %1981  ;;  %v1406_v51 = vadd.f32 %v1342_v40, %v1277_v34  ;;  %v1343_v53 = vmul.f32 %v1980_v6, %v2412_v48  ;;  %2001 = vrcp.f32 %v1185_v4  ;;  %v1186_v42 = vadd.f32 1.0, %v1122_v43  ;;  %v2888_v34 = vld [vmem:[#allocation21_spill] sm:$0xff] }
 0x145   : > { %v1984_v56 = vpop.eup %1983  ;;  %1501 = vst [vmem:[#allocation2 + $0x1d8] sm:$0xff] %v1437_v60  ;;  %v1438_v32 = vadd.f32 %v1374_v10, %v1309_v19  ;;  %v1375_v58 = vmul.f32 %v1982_v16, %v2412_v48  ;;  %2003 = vrcp.f32 %v1154_v35  ;;  %v1091_v2 = vsub.f32 %v2883_v37, %v1027_v55  ;;  %v1313_v55 = vld [vmem:[#allocation2 + $0x1c8] sm:$0xff]  ;;  %v629_v60 = vpop.f32.mrf.mxu0  ;;  %v1282_v16 = vld [vmem:[#allocation2 + $0x80] sm:$0xff] }
 0x146   : > { %1470 = vst [vmem:[#allocation2 + $0x60] sm:$0xff] %v1406_v51  ;;  %v1407_v31 = vadd.f32 %v1343_v53, %v1278_v61  ;;  %v1344_v49 = vmul.f32 %v1984_v56, %v2412_v48  ;;  %2005 = vrcp.f32 %v1186_v42  ;;  %v1059_v25 = vmul.f32 2.0, %v2693_v1  ;;  %v1280_v1 = vld [vmem:[#allocation2 + $0x138] sm:$0xff] }
 0x147   : > { %1502 = vst [vmem:[#allocation2 + $0xd0] sm:$0xff] %v1438_v32  ;;  %v1439_v38 = vadd.f32 %v1375_v58, %v1310_v39  ;;  %v1155_v52 = vadd.f32 1.0, %v1091_v2  ;;  %v1028_v20 = vmul.f32 2.0, %v2700_v62  ;;  %v1060_v54 = vmul.f32 2.0, %v713_v5  ;;  %v721_v5 = vpop.f32.mrf.mxu1 }
 0x148   : > { %v1986_v57 = vpop.eup %1985  ;;  %1471 = vst [vmem:[#allocation2 + $0xe0] sm:$0xff] %v1407_v31  ;;  %v1408_v63 = vadd.f32 %v1344_v49, %v1279_v24  ;;  %v1123_v12 = vsub.f32 %v2884_v30, %v1059_v25  ;;  %v1029_v8 = vmul.f32 2.0, %v619_v36  ;;  %v1061_v45 = vmul.f32 2.0, %v715_v47  ;;  %v2887_v36 = vld [vmem:[#allocation6_spill] sm:$0xff]  ;;  %v1281_v47 = vld [vmem:[#allocation2 + $0x140] sm:$0xff]  ;;  %v1314_v24 = vld [vmem:[#allocation2 + $0x170] sm:$0xff] }
 0x149   : > { %v1988_v0 = vpop.eup %1987  ;;  %1503 = vst [vmem:[#allocation2 + $0xb8] sm:$0xff] %v1439_v38  ;;  %v1376_v50 = vmul.f32 %v1986_v57, %v2412_v48  ;;  %2007 = vrcp.f32 %v1155_v52  ;;  %v1092_v27 = vsub.f32 %v2885_v17, %v1028_v20  ;;  %v1124_v62 = vsub.f32 %v2886_v9, %v1060_v54  ;;  %v725_v53 = vpop.f32.mrf.mxu1  ;;  %v1283_v38 = vld [vmem:[#allocation2 + $0x1a8] sm:$0xff]  ;;  %v2889_v52 = vld [vmem:[#allocation3_spill] sm:$0xff] }
 0x14a   : > { %v1990_v3 = vpop.eup %1989  ;;  %1472 = vst [vmem:[#allocation2 + $0x188] sm:$0xff] %v1408_v63  ;;  %v1345_v14 = vmul.f32 %v1988_v0, %v2412_v48  ;;  %v1187_v28 = vadd.f32 1.0, %v1123_v12  ;;  %v1093_v21 = vsub.f32 %v2887_v36, %v1029_v8  ;;  %v1125_v41 = vsub.f32 %v2888_v34, %v1061_v45  ;;  %v631_v54 = vpop.f32.mrf.mxu0  ;;  %v1315_v63 = vld [vmem:[#allocation2 + $0x178] sm:$0xff]  ;;  %v2891_v12 = vld [vmem:[#allocation4_spill] sm:$0xff] }
 0x14b   : > { %v1992_v4 = vpop.eup %1991  ;;  %v1440_v33 = vadd.f32 %v1376_v50, %v1311_v29  ;;  %v1377_v59 = vmul.f32 %v1990_v3, %v2412_v48  ;;  %v1156_v18 = vadd.f32 1.0, %v1092_v27  ;;  %v1188_v40 = vadd.f32 1.0, %v1124_v62  ;;  %v2890_v29 = vld [vmem:[#allocation18_spill] sm:$0xff]  ;;  %v727_v45 = vpop.f32.mrf.mxu1 }
 0x14c   : > { %v1994_v19 = vpop.eup %1993  ;;  %v1409_v23 = vadd.f32 %v1345_v14, %v1280_v1  ;;  %v1346_v43 = vmul.f32 %v1992_v4, %v2412_v48  ;;  %2009 = vrcp.f32 %v1187_v28  ;;  %v1157_v6 = vadd.f32 1.0, %v1093_v21  ;;  %v1284_v1 = vld [vmem:[#allocation2 + $0x1b8] sm:$0xff]  ;;  %v1316_v14 = vld [vmem:[#allocation2 + $0x68] sm:$0xff]  ;;  %v2892_v21 = vld [vmem:[#allocation19_spill] sm:$0xff] }
 0x14d   : > { %v1996_v10 = vpop.eup %1995  ;;  %1504 = vst [vmem:[#allocation2 + $0x88] sm:$0xff] %v1440_v33  ;;  %v1441_v61 = vadd.f32 %v1377_v59, %v1312_v7  ;;  %v1378_v35 = vmul.f32 %v1994_v19, %v2412_v48  ;;  %2011 = vrcp.f32 %v1156_v18  ;;  %v1189_v51 = vadd.f32 1.0, %v1125_v41  ;;  %v635_v41 = vpop.f32.mrf.mxu0  ;;  %v2893_v33 = vld [vmem:[#allocation9_spill] sm:$0xff] }
 0x14e   : > { %1473 = vst [vmem:[#allocation2 + $0x138] sm:$0xff] %v1409_v23  ;;  %v1410_v39 = vadd.f32 %v1346_v43, %v1281_v47  ;;  %v1347_v42 = vmul.f32 %v1996_v10, %v2412_v48  ;;  %2013 = vrcp.f32 %v1188_v40  ;;  %v1030_v56 = vmul.f32 2.0, %v2716_v11  ;;  %v731_v18 = vpop.f32.mrf.mxu1  ;;  %v1285_v23 = vld [vmem:[#allocation2 + $0x28] sm:$0xff] }
 0x14f   : > { %v1998_v32 = vpop.eup %1997  ;;  %1505 = vst [vmem:[#allocation2 + $0xa8] sm:$0xff] %v1441_v61  ;;  %v1442_v58 = vadd.f32 %v1378_v35, %v1313_v55  ;;  %2015 = vrcp.f32 %v1157_v6  ;;  %v1062_v37 = vmul.f32 2.0, %v2720_v13  ;;  %v1031_v2 = vmul.f32 2.0, %v625_v46  ;;  %v2894_v35 = vld [vmem:[#allocation10_spill] sm:$0xff] }
 0x150   : > { %v2000_v31 = vpop.eup %1999  ;;  %1474 = vst [vmem:[#allocation2 + $0x140] sm:$0xff] %v1410_v39  ;;  %v1411_v49 = vadd.f32 %v1347_v42, %v1282_v16  ;;  %v1379_v25 = vmul.f32 %v1998_v32, %v2412_v48  ;;  %2017 = vrcp.f32 %v1189_v51  ;;  %v1094_v20 = vsub.f32 %v2889_v52, %v1030_v56  ;;  %v637_v39 = vpop.f32.mrf.mxu0  ;;  %v1317_v32 = vld [vmem:[#allocation2 + $0x190] sm:$0xff] }
 0x151   : > { %v2002_v57 = vpop.eup %2001  ;;  %1506 = vst [vmem:[#allocation2 + $0x1c8] sm:$0xff] %v1442_v58  ;;  %v1348_v11 = vmul.f32 %v2000_v31, %v2412_v48  ;;  %v1126_v30 = vsub.f32 %v2890_v29, %v1062_v37  ;;  %v1095_v13 = vsub.f32 %v2891_v12, %v1031_v2  ;;  %v1063_v8 = vmul.f32 2.0, %v721_v5  ;;  %v1286_v31 = vld [vmem:[#allocation2 + $0x1e8] sm:$0xff] }
 0x152   : > { %v2004_v46 = vpop.eup %2003  ;;  %1475 = vst [vmem:[#allocation2 + $0x80] sm:$0xff] %v1411_v49  ;;  %v1443_v0 = vadd.f32 %v1379_v25, %v1314_v24  ;;  %v1380_v50 = vmul.f32 %v2002_v57, %v2412_v48  ;;  %v1158_v17 = vadd.f32 1.0, %v1094_v20  ;;  %v1032_v27 = vmul.f32 2.0, %v629_v60  ;;  %v2895_v49 = vld [vmem:[#allocation7_spill] sm:$0xff] }
 0x153   : > { %v2006_v9 = vpop.eup %2005  ;;  %v1412_v62 = vadd.f32 %v1348_v11, %v1283_v38  ;;  %v1349_v3 = vmul.f32 %v2004_v46, %v2412_v48  ;;  %v1190_v7 = vadd.f32 1.0, %v1126_v30  ;;  %v1159_v28 = vadd.f32 1.0, %v1095_v13  ;;  %v1287_v30 = vld [vmem:[#allocation2 + $0xf8] sm:$0xff]  ;;  %v733_v13 = vpop.f32.mrf.mxu1 }
 0x154   : > { %1507 = vst [vmem:[#allocation2 + $0x170] sm:$0xff] %v1443_v0  ;;  %v1444_v36 = vadd.f32 %v1380_v50, %v1315_v63  ;;  %v1381_v5 = vmul.f32 %v2006_v9, %v2412_v48  ;;  %2019 = vrcp.f32 %v1158_v17  ;;  %v1127_v34 = vsub.f32 %v2892_v21, %v1063_v8  ;;  %v1319_v46 = vld [vmem:[#allocation2 + $0x38] sm:$0xff]  ;;  %v2896_v17 = vld [vmem:[#allocation8_spill] sm:$0xff]  ;;  %v2897_v9 = vld [vmem:[#allocation17_spill] sm:$0xff] }
 0x155   : > { %1476 = vst [vmem:[#allocation2 + $0x1a8] sm:$0xff] %v1412_v62  ;;  %v1413_v4 = vadd.f32 %v1349_v3, %v1284_v1  ;;  %2021 = vrcp.f32 %v1190_v7  ;;  %v1096_v59 = vsub.f32 %v2893_v33, %v1032_v27  ;;  %v1064_v47 = vmul.f32 2.0, %v725_v53 }
 0x156   : > { %v2008_v40 = vpop.eup %2007  ;;  %1508 = vst [vmem:[#allocation2 + $0x178] sm:$0xff] %v1444_v36  ;;  %v1445_v19 = vadd.f32 %v1381_v5, %v1316_v14  ;;  %2023 = vrcp.f32 %v1159_v28  ;;  %v1191_v43 = vadd.f32 1.0, %v1127_v34  ;;  %v1033_v55 = vmul.f32 2.0, %v631_v54  ;;  %v1318_v54 = vld [vmem:[#allocation2 + $0x198] sm:$0xff]  ;;  %v1288_v5 = vld [vmem:[#allocation2 + $0x160] sm:$0xff] }
 0x157   : > { %1477 = vst [vmem:[#allocation2 + $0x1b8] sm:$0xff] %v1413_v4  ;;  %v1350_v6 = vmul.f32 %v2008_v40, %v2412_v48  ;;  %v1160_v60 = vadd.f32 1.0, %v1096_v59  ;;  %v1128_v10 = vsub.f32 %v2569_v15, %v1064_v47  ;;  %v1065_v61 = vmul.f32 2.0, %v727_v45  ;;  %v1320_v4 = vld [vmem:[#allocation2 + $0xc0] sm:$0xff]  ;;  %v1289_v59 = vld [vmem:[#allocation2 + $0x30] sm:$0xff] }
 0x158   : > { %1509 = vst [vmem:[#allocation2 + $0x68] sm:$0xff] %v1445_v19  ;;  %2025 = vrcp.f32 %v1191_v43  ;;  %v1097_v16 = vsub.f32 %v2894_v35, %v1033_v55  ;;  %v1034_v51 = vmul.f32 2.0, %v635_v41  ;;  %v1066_v53 = vmul.f32 2.0, %v731_v18  ;;  %v1321_v43 = vld [vmem:[#allocation2 + $0x1c0] sm:$0xff] }
 0x159   : > { %v2010_v42 = vpop.eup %2009  ;;  %v1414_v56 = vadd.f32 %v1350_v6, %v1285_v23  ;;  %2027 = vrcp.f32 %v1160_v60  ;;  %v1192_v58 = vadd.f32 1.0, %v1128_v10  ;;  %v1129_v24 = vsub.f32 %v2578_v44, %v1065_v61  ;;  %v1290_v10 = vld [vmem:[#allocation2 + $0x1e0] sm:$0xff] }
 0x15a   : > { %v2012_v37 = vpop.eup %2011  ;;  %v1382_v2 = vmul.f32 %v2010_v42, %v2412_v48  ;;  %v1161_v15 = vadd.f32 1.0, %v1097_v16  ;;  %v1098_v25 = vsub.f32 %v2895_v49, %v1034_v51  ;;  %v1130_v38 = vsub.f32 %v2566_v26, %v1066_v53  ;;  %v1322_v51 = vld [vmem:[#allocation2 + $0x158] sm:$0xff] }
 0x15b   : > { %v2014_v52 = vpop.eup %2013  ;;  %1478 = vst [vmem:[#allocation2 + $0x28] sm:$0xff] %v1414_v56  ;;  %v1351_v20 = vmul.f32 %v2012_v37, %v2412_v48  ;;  %2029 = vrcp.f32 %v1192_v58  ;;  %v1193_v57 = vadd.f32 1.0, %v1129_v24  ;;  %v1035_v11 = vmul.f32 2.0, %v637_v39  ;;  %v1291_v56 = vld [vmem:[#allocation2] sm:$0xff]  ;;  %v1323_v24 = vld [vmem:[#allocation2 + $0x10] sm:$0xff] }
 0x15c   : > { %v2016_v63 = vpop.eup %2015  ;;  %v1446_v29 = vadd.f32 %v1382_v2, %v1317_v32  ;;  %v1383_v44 = vmul.f32 %v2014_v52, %v2412_v48  ;;  %2031 = vrcp.f32 %v1161_v15  ;;  %v1162_v12 = vadd.f32 1.0, %v1098_v25  ;;  %v1292_v15 = vld [vmem:[#allocation2 + $0xf0] sm:$0xff]  ;;  %v1324_v52 = vld [vmem:[#allocation2 + $0x58] sm:$0xff] }
 0x15d   : > { %v2018_v8 = vpop.eup %2017  ;;  %v1415_v45 = vadd.f32 %v1351_v20, %v1286_v31  ;;  %v1352_v26 = vmul.f32 %v2016_v63, %v2412_v48  ;;  %2033 = vrcp.f32 %v1193_v57  ;;  %v1194_v0 = vadd.f32 1.0, %v1130_v38 }
 0x15e   : > { %1510 = vst [vmem:[#allocation2 + $0x190] sm:$0xff] %v1446_v29  ;;  %v1447_v50 = vadd.f32 %v1383_v44, %v1318_v54  ;;  %v1384_v1 = vmul.f32 %v2018_v8, %v2412_v48  ;;  %2035 = vrcp.f32 %v1162_v12  ;;  %v1099_v27 = vsub.f32 %v2896_v17, %v1035_v11  ;;  %v1293_v29 = vld [vmem:[#allocation2 + $0x8] sm:$0xff] }
 0x15f   : > { %v1003_v62 = vadd.f32 %v2376_v22, %v2897_v9  ;;  %1479 = vst [vmem:[#allocation2 + $0x1e8] sm:$0xff] %v1415_v45  ;;  %v1416_v3 = vadd.f32 %v1352_v26, %v1287_v30  ;;  %2037 = vrcp.f32 %v1194_v0  ;;  %v1067_v14 = vmul.f32 2.0, %v733_v13  ;;  %v1325_v13 = vld [vmem:[#allocation2 + $0xa0] sm:$0xff] }
 0x160   : > { %1511 = vst [vmem:[#allocation2 + $0x198] sm:$0xff] %v1447_v50  ;;  %v1448_v7 = vadd.f32 %v1384_v1, %v1319_v46  ;;  %v1163_v28 = vadd.f32 1.0, %v1099_v27 }
 0x161   : > { %v2020_v36 = vpop.eup %2019  ;;  %1480 = vst [vmem:[#allocation2 + $0xf8] sm:$0xff] %v1416_v3  ;;  %v1131_v21 = vsub.f32 %v1003_v62, %v1067_v14 }
 0x162   : > { %v2022_v34 = vpop.eup %2021  ;;  %1512 = vst [vmem:[#allocation2 + $0x38] sm:$0xff] %v1448_v7  ;;  %v1353_v41 = vmul.f32 %v2020_v36, %v2412_v48  ;;  %2039 = vrcp.f32 %v1163_v28 }
 0x163   : > { %v2024_v33 = vpop.eup %2023  ;;  %v1385_v22 = vmul.f32 %v2022_v34, %v2412_v48  ;;  %v1195_v47 = vadd.f32 1.0, %v1131_v21 }
 0x164   : > { %v1417_v18 = vadd.f32 %v1353_v41, %v1288_v5  ;;  %v1354_v40 = vmul.f32 %v2024_v33, %v2412_v48 }
 0x165   : > { %v2026_v19 = vpop.eup %2025  ;;  %v1449_v23 = vadd.f32 %v1385_v22, %v1320_v4  ;;  %2041 = vrcp.f32 %v1195_v47 }
 0x166   : > { %v2028_v55 = vpop.eup %2027  ;;  %1481 = vst [vmem:[#allocation2 + $0x160] sm:$0xff] %v1417_v18  ;;  %v1418_v6 = vadd.f32 %v1354_v40, %v1289_v59  ;;  %v1386_v60 = vmul.f32 %v2026_v19, %v2412_v48 }
 0x167   : > { %1513 = vst [vmem:[#allocation2 + $0xc0] sm:$0xff] %v1449_v23  ;;  %v1355_v61 = vmul.f32 %v2028_v55, %v2412_v48 }
 0x168   : > { %v2030_v35 = vpop.eup %2029  ;;  %1482 = vst [vmem:[#allocation2 + $0x30] sm:$0xff] %v1418_v6  ;;  %v1450_v16 = vadd.f32 %v1386_v60, %v1321_v43 }
 0x169   : > { %v2032_v53 = vpop.eup %2031  ;;  %v1419_v39 = vadd.f32 %v1355_v61, %v1290_v10  ;;  %v1387_v42 = vmul.f32 %v2030_v35, %v2412_v48 }
 0x16a   : > { %v2034_v32 = vpop.eup %2033  ;;  %1514 = vst [vmem:[#allocation2 + $0x1c0] sm:$0xff] %v1450_v16  ;;  %v1356_v58 = vmul.f32 %v2032_v53, %v2412_v48 }
 0x16b   : > { %v2036_v37 = vpop.eup %2035  ;;  %1483 = vst [vmem:[#allocation2 + $0x1e0] sm:$0xff] %v1419_v39  ;;  %v1451_v2 = vadd.f32 %v1387_v42, %v1322_v51  ;;  %v1388_v31 = vmul.f32 %v2034_v32, %v2412_v48 }
 0x16c   : > { %v2038_v49 = vpop.eup %2037  ;;  %v1420_v25 = vadd.f32 %v1356_v58, %v1291_v56  ;;  %v1357_v38 = vmul.f32 %v2036_v37, %v2412_v48 }
 0x16d   : > { %1515 = vst [vmem:[#allocation2 + $0x158] sm:$0xff] %v1451_v2  ;;  %v1452_v20 = vadd.f32 %v1388_v31, %v1323_v24  ;;  %v1389_v54 = vmul.f32 %v2038_v49, %v2412_v48 }
 0x16e   : > { %1484 = vst [vmem:[#allocation2] sm:$0xff] %v1420_v25  ;;  %v1421_v57 = vadd.f32 %v1357_v38, %v1292_v15 }
 0x16f   : > { %v2040_v11 = vpop.eup %2039  ;;  %1516 = vst [vmem:[#allocation2 + $0x10] sm:$0xff] %v1452_v20  ;;  %v1453_v63 = vadd.f32 %v1389_v54, %v1324_v52 }
 0x170   : > { %1485 = vst [vmem:[#allocation2 + $0xf0] sm:$0xff] %v1421_v57  ;;  %v1358_v44 = vmul.f32 %v2040_v11, %v2412_v48 }
 0x171   : > { %1517 = vst [vmem:[#allocation2 + $0x58] sm:$0xff] %v1453_v63 }
 0x172   : > { %v2042_v30 = vpop.eup %2041  ;;  %v1422_v12 = vadd.f32 %v1358_v44, %v1293_v29 }
 0x173   : > { %v1390_v8 = vmul.f32 %v2042_v30, %v2412_v48 }
 0x174   : > { %1486 = vst [vmem:[#allocation2 + $0x8] sm:$0xff] %v1422_v12 }
 0x175   : > { %v1454_v45 = vadd.f32 %v1390_v8, %v1325_v13 }
 0x177   : > { %1518 = vst [vmem:[#allocation2 + $0xa0] sm:$0xff] %v1454_v45 }
 0x178 PF: > { %p1865_p10 = scmp.ne.s32.totalorder %s2065_s15, 1 }
 0x17a   : > { %1522 = sbr.rel (%p1865_p10) target bundleno = 587 (0x24b), region = 48 }
 0x17f   : > { %v1527_v26 = vld [vmem:[#allocation2 + $0x50] sm:$0xff]  ;;  %v1528_v46 = vld [vmem:[#allocation2 + $0x168] sm:$0xff]  ;;  %v1525_v62 = vld [vmem:[#allocation2 + $0xd8] sm:$0xff]  ;;  %vm1683_vm1 = vcmask 7168  }
 0x180   : > { %v1523_v0 = vld [vmem:[#allocation2 + $0xb0] sm:$0xff]  ;;  %v1593_v50 = vadd.f32 %v1528_v46, %v1527_v26  ;;  %v1530_v27 = vld [vmem:[#allocation2 + $0x48] sm:$0xff]  ;;  %v1526_v3 = vld [vmem:[#allocation2 + $0x18] sm:$0xff] }
 0x181   : > { %v1524_v1 = vld [vmem:[#allocation2 + $0x1b0] sm:$0xff]  ;;  %v1590_v48 = vadd.f32 %v1526_v3, %v1525_v62  ;;  %v1533_v7 = vld [vmem:[#allocation2 + $0x118] sm:$0xff]  ;;  %v1531_v36 = vld [vmem:[#allocation2 + $0x180] sm:$0xff] }
 0x182   : > { %v1529_v17 = vld [vmem:[#allocation2 + $0x130] sm:$0xff]  ;;  %v1587_v9 = vadd.f32 %v1524_v1, %v1523_v0  ;;  %1594 = vadd.xlane.f32.xlu1 %v1593_v50  ;;  %v1534_v28 = vld [vmem:[#allocation2 + $0x98] sm:$0xff]  ;;  %v1537_v41 = vld [vmem:[#allocation2 + $0x108] sm:$0xff] }
 0x183   : > { %v1596_v14 = vadd.f32 %v1530_v27, %v1529_v17  ;;  %v1532_v5 = vld [vmem:[#allocation2 + $0x110] sm:$0xff]  ;;  %v1602_v21 = vadd.f32 %v1534_v28, %v1533_v7  ;;  %v1538_v4 = vld [vmem:[#allocation2 + $0x60] sm:$0xff]  ;;  %v1541_v18 = vld [vmem:[#allocation2 + $0x138] sm:$0xff] }
 0x184   : > { %1588 = vadd.xlane.f32.xlu0 %v1587_v9  ;;  %v1599_v34 = vadd.f32 %v1532_v5, %v1531_v36  ;;  %v1535_v33 = vld [vmem:[#allocation2 + $0x120] sm:$0xff]  ;;  %v1536_v22 = vld [vmem:[#allocation2 + $0x150] sm:$0xff]  ;;  %v1608_v59 = vadd.f32 %v1538_v4, %v1537_v41  ;;  %v1540_v23 = vld [vmem:[#allocation2 + $0x188] sm:$0xff] }
 0x185   : > { %v1605_v47 = vadd.f32 %v1536_v22, %v1535_v33  ;;  %v1542_v40 = vld [vmem:[#allocation2 + $0x140] sm:$0xff]  ;;  %v1545_v6 = vld [vmem:[#allocation2 + $0x1b8] sm:$0xff]  ;;  %v1546_v60 = vld [vmem:[#allocation2 + $0x28] sm:$0xff] }
 0x186   : > { %1597 = vadd.xlane.f32.xlu1 %v1596_v14  ;;  %v1539_v19 = vld [vmem:[#allocation2 + $0xe0] sm:$0xff]  ;;  %v1614_v43 = vadd.f32 %v1542_v40, %v1541_v18  ;;  %v1544_v61 = vld [vmem:[#allocation2 + $0x1a8] sm:$0xff]  ;;  %v1620_v35 = vadd.f32 %v1546_v60, %v1545_v6  ;;  %v1550_v53 = vld [vmem:[#allocation2 + $0x30] sm:$0xff] }
 0x187   : > { %v1611_v55 = vadd.f32 %v1540_v23, %v1539_v19  ;;  %v1543_v10 = vld [vmem:[#allocation2 + $0x80] sm:$0xff]  ;;  %v1547_v39 = vld [vmem:[#allocation2 + $0x1e8] sm:$0xff]  ;;  %v1548_v42 = vld [vmem:[#allocation2 + $0xf8] sm:$0xff] }
 0x188   : > { %1591 = vadd.xlane.f32.xlu0 %v1590_v48  ;;  %v1617_v16 = vadd.f32 %v1544_v61, %v1543_v10  ;;  %v1549_v51 = vld [vmem:[#allocation2 + $0x160] sm:$0xff]  ;;  %v1623_v32 = vadd.f32 %v1548_v42, %v1547_v39  ;;  %v1553_v58 = vld [vmem:[#allocation2 + $0xf0] sm:$0xff]  ;;  %v1554_v24 = vld [vmem:[#allocation2 + $0x8] sm:$0xff] }
 0x189   : > { %v1626_v56 = vadd.f32 %v1550_v53, %v1549_v51  ;;  %v1551_v37 = vld [vmem:[#allocation2 + $0x1e0] sm:$0xff]  ;;  %v1632_v31 = vadd.f32 %v1554_v24, %v1553_v58  ;;  %v1558_v25 = vld [vmem:[#allocation2 + $0xc8] sm:$0xff]  ;;  %v1556_v52 = vld [vmem:[#allocation2 + $0x1d0] sm:$0xff] }
 0x18a   : > { %1603 = vadd.xlane.f32.xlu1 %v1602_v21  ;;  %v1552_v2 = vld [vmem:[#allocation2] sm:$0xff]  ;;  %v1555_v38 = vld [vmem:[#allocation2 + $0x148] sm:$0xff]  ;;  %v1560_v29 = vld [vmem:[#allocation2 + $0x1f8] sm:$0xff] }
 0x18b   : > { %v1629_v15 = vadd.f32 %v1552_v2, %v1551_v37  ;;  %v1557_v49 = vld [vmem:[#allocation2 + $0x100] sm:$0xff]  ;;  %v1635_v54 = vadd.f32 %v1556_v52, %v1555_v38  ;;  %v1562_v11 = vld [vmem:[#allocation2 + $0x128] sm:$0xff]  ;;  %v1566_v13 = vld [vmem:[#allocation2 + $0x78] sm:$0xff] }
 0x18c   : > { %1600 = vadd.xlane.f32.xlu0 %v1599_v34  ;;  %v1638_v20 = vadd.f32 %v1558_v25, %v1557_v49  ;;  %v1561_v57 = vld [vmem:[#allocation2 + $0x20] sm:$0xff]  ;;  %v1565_v12 = vld [vmem:[#allocation2 + $0xe8] sm:$0xff]  ;;  %v1564_v45 = vld [vmem:[#allocation2 + $0x1f0] sm:$0xff] }
 0x18d   : > { %v1559_v63 = vld [vmem:[#allocation2 + $0x40] sm:$0xff]  ;;  %v1644_v44 = vadd.f32 %v1562_v11, %v1561_v57  ;;  %v1650_v26 = vadd.f32 %v1566_v13, %v1565_v12  ;;  %v1569_v0 = vld [vmem:[#allocation2 + $0x1d8] sm:$0xff]  ;;  %v1570_v50 = vld [vmem:[#allocation2 + $0xd0] sm:$0xff] }
 0x18e   : > { %1609 = vadd.xlane.f32.xlu1 %v1608_v59  ;;  %v1641_v30 = vadd.f32 %v1560_v29, %v1559_v63  ;;  %v1563_v8 = vld [vmem:[#allocation2 + $0x1a0] sm:$0xff]  ;;  %v1567_v1 = vld [vmem:[#allocation2 + $0x70] sm:$0xff]  ;;  %v1656_v27 = vadd.f32 %v1570_v50, %v1569_v0  ;;  %v1573_v62 = vld [vmem:[#allocation2 + $0xa8] sm:$0xff] }
 0x18f   : > { %v1647_v46 = vadd.f32 %v1564_v45, %v1563_v8  ;;  %v1568_v17 = vld [vmem:[#allocation2 + $0x90] sm:$0xff]  ;;  %v1574_v3 = vld [vmem:[#allocation2 + $0x1c8] sm:$0xff]  ;;  %v1571_v14 = vld [vmem:[#allocation2 + $0xb8] sm:$0xff] }
 0x190   : > { %1606 = vadd.xlane.f32.xlu0 %v1605_v47  ;;  %v1653_v9 = vadd.f32 %v1568_v17, %v1567_v1  ;;  %v1572_v48 = vld [vmem:[#allocation2 + $0x88] sm:$0xff]  ;;  %v1662_v7 = vadd.f32 %v1574_v3, %v1573_v62  ;;  %v1578_v5 = vld [vmem:[#allocation2 + $0x190] sm:$0xff]  ;;  %v1576_v34 = vld [vmem:[#allocation2 + $0x178] sm:$0xff] }
 0x191   : > { %v1659_v28 = vadd.f32 %v1572_v48, %v1571_v14  ;;  %v1577_v36 = vld [vmem:[#allocation2 + $0x68] sm:$0xff]  ;;  %v1575_v21 = vld [vmem:[#allocation2 + $0x170] sm:$0xff]  ;;  %v1581_v33 = vld [vmem:[#allocation2 + $0xc0] sm:$0xff] }
 0x192   : > { %1615 = vadd.xlane.f32.xlu1 %v1614_v43  ;;  %v1668_v41 = vadd.f32 %v1578_v5, %v1577_v36  ;;  %v1665_v4 = vadd.f32 %v1576_v34, %v1575_v21  ;;  %v1582_v22 = vld [vmem:[#allocation2 + $0x1c0] sm:$0xff]  ;;  %v1579_v59 = vld [vmem:[#allocation2 + $0x198] sm:$0xff] }
 0x193   : > { %v1580_v47 = vld [vmem:[#allocation2 + $0x38] sm:$0xff]  ;;  %v1674_v18 = vadd.f32 %v1582_v22, %v1581_v33  ;;  %v1586_v23 = vld [vmem:[#allocation2 + $0xa0] sm:$0xff] }
 0x194   : > { %1612 = vadd.xlane.f32.xlu0 %v1611_v55  ;;  %v1671_v40 = vadd.f32 %v1580_v47, %v1579_v59  ;;  %v1585_v19 = vld [vmem:[#allocation2 + $0x58] sm:$0xff]  ;;  %v1584_v55 = vld [vmem:[#allocation2 + $0x10] sm:$0xff] }
 0x195   : > { %v1583_v43 = vld [vmem:[#allocation2 + $0x158] sm:$0xff]  ;;  %v1680_v6 = vadd.f32 %v1586_v23, %v1585_v19 }
 0x196   : > { %1621 = vadd.xlane.f32.xlu1 %v1620_v35  ;;  %v1677_v60 = vadd.f32 %v1584_v55, %v1583_v43 }
 0x198   : > { %1618 = vadd.xlane.f32.xlu0 %v1617_v16 }
 0x19a   : > { %1627 = vadd.xlane.f32.xlu1 %v1626_v56 }
 0x19c   : > { %1624 = vadd.xlane.f32.xlu0 %v1623_v32 }
 0x19e   : > { %1633 = vadd.xlane.f32.xlu1 %v1632_v31 }
 0x1a0   : > { %1630 = vadd.xlane.f32.xlu0 %v1629_v15 }
 0x1a2   : > { %1639 = vadd.xlane.f32.xlu1 %v1638_v20 }
 0x1a4   : > { %1636 = vadd.xlane.f32.xlu0 %v1635_v54 }
 0x1a6   : > { %1645 = vadd.xlane.f32.xlu1 %v1644_v44 }
 0x1a8   : > { %1642 = vadd.xlane.f32.xlu0 %v1641_v30 }
 0x1aa   : > { %1651 = vadd.xlane.f32.xlu1 %v1650_v26 }
 0x1ac   : > { %1648 = vadd.xlane.f32.xlu0 %v1647_v46 }
 0x1ae   : > { %1657 = vadd.xlane.f32.xlu1 %v1656_v27 }
 0x1b0   : > { %1654 = vadd.xlane.f32.xlu0 %v1653_v9 }
 0x1b2   : > { %1663 = vadd.xlane.f32.xlu1 %v1662_v7 }
 0x1b4   : > { %1660 = vadd.xlane.f32.xlu0 %v1659_v28 }
 0x1b6   : > { %1669 = vadd.xlane.f32.xlu1 %v1668_v41 }
 0x1b8   : > { %1666 = vadd.xlane.f32.xlu0 %v1665_v4 }
 0x1ba   : > { %1675 = vadd.xlane.f32.xlu1 %v1674_v18 }
 0x1bc   : > { %1672 = vadd.xlane.f32.xlu0 %v1671_v40 }
 0x1be   : > { %1681 = vadd.xlane.f32.xlu1 %v1680_v6 }
 0x1c0   : > { %1678 = vadd.xlane.f32.xlu0 %v1677_v60 }
 0x20b   : > { %v1595_v10 = vpop.xlane.xlu1 %1594 }
 0x20c   : > { %1686 = vst.msk [vmem:[%s2172_s14 + $0x10] sm:$0xff] %vm1683_vm1, %v1595_v10 }
 0x20d   : > { %v1589_v61 = vpop.xlane.xlu0 %1588 }
 0x20e   : > { %1684 = vst.msk [vmem:[%s2172_s14] sm:$0xff] %vm1683_vm1, %v1589_v61 }
 0x20f   : > { %v1598_v35 = vpop.xlane.xlu1 %1597 }
 0x210   : > { %1687 = vst.msk [vmem:[%s2172_s14 + $0x18] sm:$0xff] %vm1683_vm1, %v1598_v35 }
 0x211   : > { %v1592_v16 = vpop.xlane.xlu0 %1591 }
 0x212   : > { %1685 = vst.msk [vmem:[%s2172_s14 + $0x8] sm:$0xff] %vm1683_vm1, %v1592_v16 }
 0x213   : > { %v1604_v51 = vpop.xlane.xlu1 %1603 }
 0x214   : > { %1689 = vst.msk [vmem:[%s2172_s14 + $0x28] sm:$0xff] %vm1683_vm1, %v1604_v51 }
 0x215   : > { %v1601_v53 = vpop.xlane.xlu0 %1600 }
 0x216   : > { %1688 = vst.msk [vmem:[%s2172_s14 + $0x20] sm:$0xff] %vm1683_vm1, %v1601_v53 }
 0x217   : > { %v1610_v39 = vpop.xlane.xlu1 %1609 }
 0x218   : > { %1691 = vst.msk [vmem:[%s2172_s14 + $0x38] sm:$0xff] %vm1683_vm1, %v1610_v39 }
 0x219   : > { %v1607_v42 = vpop.xlane.xlu0 %1606 }
 0x21a   : > { %1690 = vst.msk [vmem:[%s2172_s14 + $0x30] sm:$0xff] %vm1683_vm1, %v1607_v42 }
 0x21b   : > { %v1616_v56 = vpop.xlane.xlu1 %1615 }
 0x21c   : > { %1693 = vst.msk [vmem:[%s2172_s14 + $0x48] sm:$0xff] %vm1683_vm1, %v1616_v56 }
 0x21d   : > { %v1613_v32 = vpop.xlane.xlu0 %1612 }
 0x21e   : > { %1692 = vst.msk [vmem:[%s2172_s14 + $0x40] sm:$0xff] %vm1683_vm1, %v1613_v32 }
 0x21f   : > { %v1622_v58 = vpop.xlane.xlu1 %1621 }
 0x220   : > { %1695 = vst.msk [vmem:[%s2172_s14 + $0x58] sm:$0xff] %vm1683_vm1, %v1622_v58 }
 0x221   : > { %v1619_v24 = vpop.xlane.xlu0 %1618 }
 0x222   : > { %1694 = vst.msk [vmem:[%s2172_s14 + $0x50] sm:$0xff] %vm1683_vm1, %v1619_v24 }
 0x223   : > { %v1628_v37 = vpop.xlane.xlu1 %1627 }
 0x224   : > { %1697 = vst.msk [vmem:[%s2172_s14 + $0x68] sm:$0xff] %vm1683_vm1, %v1628_v37 }
 0x225   : > { %v1625_v2 = vpop.xlane.xlu0 %1624 }
 0x226   : > { %1696 = vst.msk [vmem:[%s2172_s14 + $0x60] sm:$0xff] %vm1683_vm1, %v1625_v2 }
 0x227   : > { %v1634_v31 = vpop.xlane.xlu1 %1633 }
 0x228   : > { %1699 = vst.msk [vmem:[%s2172_s14 + $0x78] sm:$0xff] %vm1683_vm1, %v1634_v31 }
 0x229   : > { %v1631_v15 = vpop.xlane.xlu0 %1630 }
 0x22a   : > { %1698 = vst.msk [vmem:[%s2172_s14 + $0x70] sm:$0xff] %vm1683_vm1, %v1631_v15 }
 0x22b   : > { %v1640_v49 = vpop.xlane.xlu1 %1639 }
 0x22c   : > { %1701 = vst.msk [vmem:[%s2172_s14 + $0x88] sm:$0xff] %vm1683_vm1, %v1640_v49 }
 0x22d   : > { %v1637_v25 = vpop.xlane.xlu0 %1636 }
 0x22e   : > { %1700 = vst.msk [vmem:[%s2172_s14 + $0x80] sm:$0xff] %vm1683_vm1, %v1637_v25 }
 0x22f   : > { %v1646_v38 = vpop.xlane.xlu1 %1645 }
 0x230   : > { %1703 = vst.msk [vmem:[%s2172_s14 + $0x98] sm:$0xff] %vm1683_vm1, %v1646_v38 }
 0x231   : > { %v1643_v52 = vpop.xlane.xlu0 %1642 }
 0x232   : > { %1702 = vst.msk [vmem:[%s2172_s14 + $0x90] sm:$0xff] %vm1683_vm1, %v1643_v52 }
 0x233   : > { %v1652_v20 = vpop.xlane.xlu1 %1651 }
 0x234   : > { %1705 = vst.msk [vmem:[%s2172_s14 + $0xa8] sm:$0xff] %vm1683_vm1, %v1652_v20 }
 0x235   : > { %v1649_v54 = vpop.xlane.xlu0 %1648 }
 0x236   : > { %1704 = vst.msk [vmem:[%s2172_s14 + $0xa0] sm:$0xff] %vm1683_vm1, %v1649_v54 }
 0x237   : > { %v1658_v57 = vpop.xlane.xlu1 %1657 }
 0x238   : > { %1707 = vst.msk [vmem:[%s2172_s14 + $0xb8] sm:$0xff] %vm1683_vm1, %v1658_v57 }
 0x239   : > { %v1655_v11 = vpop.xlane.xlu0 %1654 }
 0x23a   : > { %1706 = vst.msk [vmem:[%s2172_s14 + $0xb0] sm:$0xff] %vm1683_vm1, %v1655_v11 }
 0x23b   : > { %v1664_v63 = vpop.xlane.xlu1 %1663 }
 0x23c   : > { %1709 = vst.msk [vmem:[%s2172_s14 + $0xc8] sm:$0xff] %vm1683_vm1, %v1664_v63 }
 0x23d   : > { %v1661_v29 = vpop.xlane.xlu0 %1660 }
 0x23e   : > { %1708 = vst.msk [vmem:[%s2172_s14 + $0xc0] sm:$0xff] %vm1683_vm1, %v1661_v29 }
 0x23f   : > { %v1670_v44 = vpop.xlane.xlu1 %1669 }
 0x240   : > { %1711 = vst.msk [vmem:[%s2172_s14 + $0xd8] sm:$0xff] %vm1683_vm1, %v1670_v44 }
 0x241   : > { %v1667_v30 = vpop.xlane.xlu0 %1666 }
 0x242   : > { %1710 = vst.msk [vmem:[%s2172_s14 + $0xd0] sm:$0xff] %vm1683_vm1, %v1667_v30 }
 0x243   : > { %v1676_v12 = vpop.xlane.xlu1 %1675 }
 0x244   : > { %1713 = vst.msk [vmem:[%s2172_s14 + $0xe8] sm:$0xff] %vm1683_vm1, %v1676_v12 }
 0x245   : > { %v1673_v13 = vpop.xlane.xlu0 %1672 }
 0x246   : > { %1712 = vst.msk [vmem:[%s2172_s14 + $0xe0] sm:$0xff] %vm1683_vm1, %v1673_v13 }
 0x247   : > { %v1682_v8 = vpop.xlane.xlu1 %1681 }
 0x248   : > { %1715 = vst.msk [vmem:[%s2172_s14 + $0xf8] sm:$0xff] %vm1683_vm1, %v1682_v8 }
 0x249   : > { %v1679_v45 = vpop.xlane.xlu0 %1678 }
 0x24a   : > { %1714 = vst.msk [vmem:[%s2172_s14 + $0xf0] sm:$0xff] %vm1683_vm1, %v1679_v45 }
 0x24b PF: > { %s14_s19 = sadd.s32 1, %s2081_s19   ;;  %s2898_s15 = smov %s2073_s17 }
 0x24c   : > { %p11_p11 = scmp.ge.s32.totalorder %s14_s19, 6   ;;  %s2899_s16 = smov %s2077_s18 }
 0x24d   : > { %s2900_s17 = smov %s2903_s20  ;;  %s2901_s18 = smov %s2907_s21 }
 0x24e   :  { %13 = sbr.rel (!%p11_p11) target bundleno = 3 (0x3), region = 87 }

</bundles_post_ra>
